<compile_context>
chip_gen: v6e
topology: v6e:2x2x1
jax: 0.10.0
libtpu: 0.0.40
codegen_flags: <defaults>
</compile_context>

<pallas_src>
import functools

import jax
import jax.numpy as jnp
from jax.experimental import pallas as pl
from jax.experimental.pallas import tpu as pltpu


def _round_up(x, m):
    return (x + m - 1) // m * m


# --------------------- fused single-call kernel (y in VMEM) -----------------

def _fused_cba_kernel(p_ref, w_ref, gamma_ref, beta_ref, o_ref,
                      y_scr, sum_ref, sq_ref, scale_ref, shift_ref,
                      *, m_real, eps):
    """grid=(2, grid_m): phase 0 = conv+stats into VMEM, phase 1 = BN+ReLU."""
    phase = pl.program_id(0)
    j = pl.program_id(1)

    @pl.when(jnp.logical_and(phase == 0, j == 0))
    def _():
        sum_ref[...] = jnp.zeros_like(sum_ref)
        sq_ref[...] = jnp.zeros_like(sq_ref)

    @pl.when(phase == 0)
    def _():
        y = jnp.dot(p_ref[...], w_ref[...], preferred_element_type=jnp.float32)
        y_scr[j] = y
        # Rows >= real M come from zero-padded patches -> y == 0 there, so
        # they contribute nothing; the glue divides by the real M.
        sum_ref[...] += jnp.sum(y, axis=0, keepdims=True)
        sq_ref[...] += jnp.sum(y * y, axis=0, keepdims=True)

    @pl.when(phase == 1)
    def _():
        @pl.when(j == 0)
        def _():
            mean = sum_ref[...] * (1.0 / m_real)
            # One-pass variance (guarded); error is dominated by the bf16
            # MXU inputs for this block's tolerance.
            var = jnp.maximum(sq_ref[...] * (1.0 / m_real) - mean * mean, 0.0)
            scale = gamma_ref[...] * jax.lax.rsqrt(var + eps)
            scale_ref[...] = scale
            shift_ref[...] = beta_ref[...] - mean * scale
        o_ref[...] = jnp.maximum(
            y_scr[j] * scale_ref[...] + shift_ref[...], 0.0
        ).astype(o_ref.dtype)


# --------------------- two-pass fallback kernels (large layers) -------------

def _conv_partial_stats_kernel(p_ref, w_ref, y_ref, sum_ref, sq_ref):
    """Conv matmul -> bf16 y tile + per-tile partial sum / sum-sq (parallel)."""
    y = jnp.dot(p_ref[...], w_ref[...], preferred_element_type=jnp.float32)
    y_ref[...] = y.astype(y_ref.dtype)                    # bf16 intermediate
    sum_ref[...] = jnp.sum(y, axis=0, keepdims=True)[None]
    sq_ref[...] = jnp.sum(y * y, axis=0, keepdims=True)[None]


def _norm_relu_kernel(y_ref, scale_ref, shift_ref, o_ref):
    """Folded BatchNorm (y*scale + shift) + ReLU, lane-dense."""
    o_ref[...] = jnp.maximum(
        y_ref[...].astype(jnp.float32) * scale_ref[...] + shift_ref[...],
        0.0).astype(o_ref.dtype)


# --------------------------------- glue -------------------------------------

def _im2col(x_nchw, kernel_size, stride, padding):
    """Plain-JAX glue: NCHW -> (N*Ho*Wo, Cin*KH*KW) patch matrix (bf16 in/out).

    Column ordering matches PyTorch's weight flattening order (Cin, KH, KW).
    """
    n, cin, h, w = x_nchw.shape
    kh = kw = kernel_size
    if padding:
        x_nchw = jnp.pad(
            x_nchw, ((0, 0), (0, 0), (padding, padding), (padding, padding)))
        h, w = h + 2 * padding, w + 2 * padding
    ho = (h - kh) // stride + 1
    wo = (w - kw) // stride + 1

    slices = []
    for i in range(kh):
        for j in range(kw):
            sl = x_nchw[:, :, i:i + (ho - 1) * stride + 1:stride,
                              j:j + (wo - 1) * stride + 1:stride]
            slices.append(sl)                       # (N, Cin, Ho, Wo)
    patches = jnp.stack(slices, axis=0)             # (KH*KW, N, Cin, Ho, Wo)
    patches = jnp.transpose(patches, (1, 3, 4, 2, 0))   # (N, Ho, Wo, Cin, KH*KW)
    patches = patches.reshape(n * ho * wo, cin * kh * kw)
    return patches, ho, wo


def cba_block_forward(x_nchw, params, *, kernel_size, stride=1, padding=0,
                      eps=1e-5, tm=512):
    """CBABlock forward: Conv2d -> BatchNorm2d (train stats) -> ReLU."""
    n, cin, _, _ = x_nchw.shape
    w = params["conv_w"]                    # (Cout, Cin, KH, KW) PyTorch layout
    gamma = params["bn_gamma"].astype(jnp.float32)
    beta = params["bn_beta"].astype(jnp.float32)
    cout = w.shape[0]

    # TODO(synk): fuse patch extraction into the conv kernel (grid over
    # N / Ho-row tiles on NHWC input windows) to remove the KH*KW-fold HBM
    # expansion of im2col — top remaining item for bandwidth-limited parts.
    patches, ho, wo = _im2col(x_nchw.astype(jnp.bfloat16), kernel_size,
                              stride, padding)
    m, k = patches.shape

    # Lane-dense padding of K and Cout.
    # TODO(synk): 256-align kp/coutp (and use 256-wide output tiles) when K
    # and Cout are large — v6e/v7x MXUs are 2x256x256.
    kp = _round_up(k, 128)
    coutp = _round_up(cout, 128)

    # Row tile: clamp for small M, keep a multiple of 16 (bf16 sublane pack).
    tm = max(16, _round_up(min(tm, _round_up(m, 16)), 16))
    m_pad = _round_up(m, tm)
    grid_m = m_pad // tm

    # bf16 staging throughout (no f32 copy of the expanded patch matrix).
    patches_p = jnp.pad(patches, ((0, m_pad - m), (0, kp - k)))
    w2d = jnp.transpose(w.reshape(cout, k).astype(jnp.bfloat16), (1, 0))
    w2d_p = jnp.pad(w2d, ((0, kp - k), (0, coutp - cout)))
    gamma_p = jnp.pad(gamma, (0, coutp - cout))
    beta_p = jnp.pad(beta, (0, coutp - cout))
    gamma2d = gamma_p.reshape(1, coutp)
    beta2d = beta_p.reshape(1, coutp)

    vmem_limit = 48 * 1024 * 1024          # explicit (v5e default is 16 MiB)
    fused_est = (m_pad * coutp * 4          # resident y scratch
                 + 2 * tm * kp * 2          # double-buffered patch tiles
                 + 2 * kp * coutp * 2       # double-buffered weight
                 + 2 * tm * coutp * 4       # double-buffered output tiles
                 + 16 * coutp * 4)          # small scratch
    use_fused = fused_est <= 36 * 1024 * 1024   # fits comfortably on v7x too

    if use_fused:
        # ---- Single fused call: conv + stats + BN-fold + ReLU -------------
        kernel = functools.partial(_fused_cba_kernel, m_real=float(m), eps=eps)
        out2d = pl.pallas_call(
            kernel,
            out_shape=jax.ShapeDtypeStruct((m_pad, coutp), jnp.float32),
            grid=(2, grid_m),
            in_specs=[
                pl.BlockSpec((tm, kp), lambda p, j: ((1 - p) * j, 0)),
                pl.BlockSpec((kp, coutp), lambda p, j: (0, 0)),
                pl.BlockSpec((1, coutp), lambda p, j: (0, 0)),
                pl.BlockSpec((1, coutp), lambda p, j: (0, 0)),
            ],
            # Output block index pinned to 0 during phase 0 so no garbage
            # writebacks happen; each tile is written exactly once in phase 1.
            out_specs=pl.BlockSpec((tm, coutp), lambda p, j: (p * j, 0)),
            scratch_shapes=[
                pltpu.VMEM((grid_m, tm, coutp), jnp.float32),  # resident y
                pltpu.VMEM((1, coutp), jnp.float32),           # sum
                pltpu.VMEM((1, coutp), jnp.float32),           # sum of squares
                pltpu.VMEM((1, coutp), jnp.float32),           # folded scale
                pltpu.VMEM((1, coutp), jnp.float32),           # folded shift
            ],
            compiler_params=pltpu.CompilerParams(
                dimension_semantics=("arbitrary", "arbitrary"),
                vmem_limit_bytes=vmem_limit),
        )(patches_p, w2d_p, gamma2d, beta2d)
    else:
        # ---- Two-pass fallback: bf16 intermediate y, parallel partial stats
        y2d, psum, psq = pl.pallas_call(
            _conv_partial_stats_kernel,
            out_shape=(jax.ShapeDtypeStruct((m_pad, coutp), jnp.bfloat16),
                       jax.ShapeDtypeStruct((grid_m, 1, coutp), jnp.float32),
                       jax.ShapeDtypeStruct((grid_m, 1, coutp), jnp.float32)),
            grid=(grid_m,),
            in_specs=[pl.BlockSpec((tm, kp), lambda i: (i, 0)),
                      pl.BlockSpec((kp, coutp), lambda i: (0, 0))],
            out_specs=(pl.BlockSpec((tm, coutp), lambda i: (i, 0)),
                       pl.BlockSpec((1, 1, coutp), lambda i: (i, 0, 0)),
                       pl.BlockSpec((1, 1, coutp), lambda i: (i, 0, 0))),
            compiler_params=pltpu.CompilerParams(
                dimension_semantics=("parallel",),   # both v7x cores run
                vmem_limit_bytes=vmem_limit),
        )(patches_p, w2d_p)

        # Tiny glue: reduce partial stats, fold BN into scale/shift.
        s = jnp.sum(psum[:, 0, :], axis=0)
        sq = jnp.sum(psq[:, 0, :], axis=0)
        mean = s / float(m)
        var = jnp.maximum(sq / float(m) - mean * mean, 0.0)
        scale = gamma_p * jax.lax.rsqrt(var + eps)
        shift = beta_p - mean * scale

        out2d = pl.pallas_call(
            _norm_relu_kernel,
            out_shape=jax.ShapeDtypeStruct((m_pad, coutp), jnp.float32),
            grid=(grid_m,),
            in_specs=[pl.BlockSpec((tm, coutp), lambda i: (i, 0)),
                      pl.BlockSpec((1, coutp), lambda i: (0, 0)),
                      pl.BlockSpec((1, coutp), lambda i: (0, 0))],
            out_specs=pl.BlockSpec((tm, coutp), lambda i: (i, 0)),
            compiler_params=pltpu.CompilerParams(
                dimension_semantics=("parallel",),
                vmem_limit_bytes=vmem_limit),
        )(y2d, scale.reshape(1, coutp), shift.reshape(1, coutp))

    # Slice away padding; (M, Cout) -> NHWC -> NCHW (PyTorch output layout).
    # TODO(synk): keep NHWC / fuse this transpose into the consumer (or emit
    # the transposed layout in-kernel) to avoid an extra HBM round trip.
    out = out2d[:m, :cout].reshape(n, ho, wo, cout)
    return jnp.transpose(out, (0, 3, 1, 2))


# ------------------------------ init & reference ----------------------------

def init_params(key, in_channels, out_channels, kernel_size):
    """Deterministic init mimicking PyTorch Conv2d / BatchNorm2d defaults."""
    kw, kb = jax.random.split(key)
    fan_in = in_channels * kernel_size * kernel_size
    bound = 1.0 / jnp.sqrt(float(fan_in))
    conv_w = jax.random.uniform(
        kw, (out_channels, in_channels, kernel_size, kernel_size),
        minval=-bound, maxval=bound, dtype=jnp.float32)
    conv_b = jax.random.uniform(
        kb, (out_channels,), minval=-bound, maxval=bound, dtype=jnp.float32)
    bn_gamma = jnp.ones((out_channels,), jnp.float32)
    bn_beta = jnp.zeros((out_channels,), jnp.float32)
    return dict(conv_w=conv_w, conv_b=conv_b, bn_gamma=bn_gamma, bn_beta=bn_beta)


def _reference(x, params, *, stride, padding, eps=1e-5):
    """Pure-JAX reference (lax.conv + bias + BN train-stats + ReLU)."""
    y = jax.lax.conv_general_dilated(
        x, params["conv_w"], window_strides=(stride, stride),
        padding=[(padding, padding), (padding, padding)],
        dimension_numbers=("NCHW", "OIHW", "NCHW"))
    y = y + params["conv_b"][None, :, None, None]
    mean = jnp.mean(y, axis=(0, 2, 3), keepdims=True)
    var = jnp.mean((y - mean) ** 2, axis=(0, 2, 3), keepdims=True)
    y = (y - mean) * jax.lax.rsqrt(var + eps)
    y = params["bn_gamma"][None, :, None, None] * y + \
        params["bn_beta"][None, :, None, None]
    return jnp.maximum(y, 0.0)


if __name__ == "__main__":
    # CBABlock(in_channels=4, out_channels=8, kernel_size=3) defaults:
    # stride=1, padding=0, activation='r', transpose=0, norm='bn'.
    N, CIN, COUT, K, H, W = 2, 4, 8, 3, 16, 16
    STRIDE, PADDING = 1, 0

    key = jax.random.PRNGKey(0)
    kx, kp = jax.random.split(key)
    x = jax.random.normal(kx, (N, CIN, H, W), dtype=jnp.float32)
    params = init_params(kp, CIN, COUT, K)

    out = jax.block_until_ready(
        cba_block_forward(x, params, kernel_size=K, stride=STRIDE,
                          padding=PADDING))

    ref = jax.block_until_ready(
        _reference(x, params, stride=STRIDE, padding=PADDING))
    assert out.shape == (N, COUT, H - K + 1, W - K + 1), out.shape
    max_err = float(jnp.max(jnp.abs(out - ref)))
    # bf16 MXU inputs with f32 accumulation: tolerance sized for bf16 rounding.
    assert jnp.allclose(out, ref, atol=3e-2, rtol=3e-2), max_err

    print("KERNEL_OK")
</pallas_src>

<mosaic_0001>
module attributes {stable_mosaic.version = 11 : i64} {
  func.func @_fused_cba_kernel(%arg0: i32, %arg1: i32, %arg2: memref<400x128xbf16, #tpu.memory_space<vmem>>, %arg3: memref<128x128xbf16, #tpu.memory_space<vmem>>, %arg4: memref<1x128xf32, #tpu.memory_space<vmem>>, %arg5: memref<1x128xf32, #tpu.memory_space<vmem>>, %arg6: memref<400x128xf32, #tpu.memory_space<vmem>>, %arg7: memref<1x400x128xf32, #tpu.memory_space<vmem>>, %arg8: memref<1x128xf32, #tpu.memory_space<vmem>>, %arg9: memref<1x128xf32, #tpu.memory_space<vmem>>, %arg10: memref<1x128xf32, #tpu.memory_space<vmem>>, %arg11: memref<1x128xf32, #tpu.memory_space<vmem>>) attributes {dimension_semantics = [#tpu.dimension_semantics<arbitrary>, #tpu.dimension_semantics<arbitrary>], iteration_bounds = array<i64: 2, 1>, scalar_prefetch = 0 : i64, scratch_operands = 5 : i64, tpu.core_type = #tpu.core_type<tc>, window_params = [{transform_indices = @transform_0, window_bounds = array<i64: 400, 128>}, {pipeline_mode = #tpu.pipeline_mode<synchronous>, transform_indices = @transform_1, window_bounds = array<i64: 128, 128>}, {pipeline_mode = #tpu.pipeline_mode<synchronous>, transform_indices = @transform_2, window_bounds = array<i64: 1, 128>}, {pipeline_mode = #tpu.pipeline_mode<synchronous>, transform_indices = @transform_3, window_bounds = array<i64: 1, 128>}, {transform_indices = @transform_4, window_bounds = array<i64: 400, 128>}]} {
    %c0_i32 = arith.constant 0 : i32
    %0 = arith.cmpi eq, %arg0, %c0_i32 : i32
    %c0_i32_0 = arith.constant 0 : i32
    %1 = arith.cmpi eq, %arg1, %c0_i32_0 : i32
    %2 = arith.andi %0, %1 : i1
    %3 = arith.extui %2 : i1 to i32
    %c0_i32_1 = arith.constant 0 : i32
    %4 = arith.cmpi ne, %3, %c0_i32_1 : i32
    scf.if %4 {
      %cst = arith.constant 0.000000e+00 : f32
      %11 = vector.broadcast %cst : f32 to vector<1x128xf32>
      %c0 = arith.constant 0 : index
      %c0_5 = arith.constant 0 : index
      %12 = vector.load %arg8[%c0, %c0_5] : memref<1x128xf32, #tpu.memory_space<vmem>>, vector<1x128xf32>
      tpu.vector_store %arg8[%c0, %c0_5], %11 {strides = array<i32>} : memref<1x128xf32, #tpu.memory_space<vmem>>, vector<1x128xf32>,
      %cst_6 = arith.constant 0.000000e+00 : f32
      %13 = vector.broadcast %cst_6 : f32 to vector<1x128xf32>
      %c0_7 = arith.constant 0 : index
      %c0_8 = arith.constant 0 : index
      %14 = vector.load %arg9[%c0_7, %c0_8] : memref<1x128xf32, #tpu.memory_space<vmem>>, vector<1x128xf32>
      tpu.vector_store %arg9[%c0_7, %c0_8], %13 {strides = array<i32>} : memref<1x128xf32, #tpu.memory_space<vmem>>, vector<1x128xf32>,
    } else {
    }
    %c0_i32_2 = arith.constant 0 : i32
    %5 = arith.cmpi eq, %arg0, %c0_i32_2 : i32
    %6 = arith.extui %5 : i1 to i32
    %c0_i32_3 = arith.constant 0 : i32
    %7 = arith.cmpi ne, %6, %c0_i32_3 : i32
    scf.if %7 {
      %c0 = arith.constant 0 : index
      %c0_5 = arith.constant 0 : index
      %11 = vector.load %arg2[%c0, %c0_5] : memref<400x128xbf16, #tpu.memory_space<vmem>>, vector<400x128xbf16>
      %c0_6 = arith.constant 0 : index
      %c0_7 = arith.constant 0 : index
      %12 = vector.load %arg3[%c0_6, %c0_7] : memref<128x128xbf16, #tpu.memory_space<vmem>>, vector<128x128xbf16>
      %cst = arith.constant dense<0.000000e+00> : vector<400x128xf32>
      %13 = tpu.matmul %11, %12, %cst {dimension_numbers = #tpu.dot_dimension_numbers<[1], [0], [0], [1], [0, 0, 1, 1], [], []>} : vector<400x128xbf16>, vector<128x128xbf16>, vector<400x128xf32> -> vector<400x128xf32>
      %14 = arith.index_cast %arg1 : i32 to index
      %c0_8 = arith.constant 0 : index
      %c0_9 = arith.constant 0 : index
      %15 = vector.load %arg7[%14, %c0_8, %c0_9] : memref<1x400x128xf32, #tpu.memory_space<vmem>>, vector<1x400x128xf32>
      %16 = vector.shape_cast %15 : vector<1x400x128xf32> to vector<400x128xf32>
      %17 = vector.shape_cast %13 : vector<400x128xf32> to vector<1x400x128xf32>
      tpu.vector_store %arg7[%14, %c0_8, %c0_9], %17 {strides = array<i32>} : memref<1x400x128xf32, #tpu.memory_space<vmem>>, vector<1x400x128xf32>,
      %c0_10 = arith.constant 0 : index
      %c0_11 = arith.constant 0 : index
      %18 = vector.load %arg8[%c0_10, %c0_11] : memref<1x128xf32, #tpu.memory_space<vmem>>, vector<1x128xf32>
      %cst_12 = arith.constant dense<0.000000e+00> : vector<128xf32>
      %19 = vector.multi_reduction <add>, %13, %cst_12 [0] : vector<400x128xf32> to vector<128xf32>
      %20 = vector.shape_cast %19 : vector<128xf32> to vector<1x128xf32>
      %21 = arith.addf %18, %20 : vector<1x128xf32>
      %c0_13 = arith.constant 0 : index
      %c0_14 = arith.constant 0 : index
      %22 = vector.load %arg8[%c0_13, %c0_14] : memref<1x128xf32, #tpu.memory_space<vmem>>, vector<1x128xf32>
      tpu.vector_store %arg8[%c0_13, %c0_14], %21 {strides = array<i32>} : memref<1x128xf32, #tpu.memory_space<vmem>>, vector<1x128xf32>,
      %c0_15 = arith.constant 0 : index
      %c0_16 = arith.constant 0 : index
      %23 = vector.load %arg9[%c0_15, %c0_16] : memref<1x128xf32, #tpu.memory_space<vmem>>, vector<1x128xf32>
      %24 = arith.mulf %13, %13 : vector<400x128xf32>
      %cst_17 = arith.constant dense<0.000000e+00> : vector<128xf32>
      %25 = vector.multi_reduction <add>, %24, %cst_17 [0] : vector<400x128xf32> to vector<128xf32>
      %26 = vector.shape_cast %25 : vector<128xf32> to vector<1x128xf32>
      %27 = arith.addf %23, %26 : vector<1x128xf32>
      %c0_18 = arith.constant 0 : index
      %c0_19 = arith.constant 0 : index
      %28 = vector.load %arg9[%c0_18, %c0_19] : memref<1x128xf32, #tpu.memory_space<vmem>>, vector<1x128xf32>
      tpu.vector_store %arg9[%c0_18, %c0_19], %27 {strides = array<i32>} : memref<1x128xf32, #tpu.memory_space<vmem>>, vector<1x128xf32>,
    } else {
    }
    %c1_i32 = arith.constant 1 : i32
    %8 = arith.cmpi eq, %arg0, %c1_i32 : i32
    %9 = arith.extui %8 : i1 to i32
    %c0_i32_4 = arith.constant 0 : i32
    %10 = arith.cmpi ne, %9, %c0_i32_4 : i32
    scf.if %10 {
      %c0_i32_5 = arith.constant 0 : i32
      %11 = arith.cmpi eq, %arg1, %c0_i32_5 : i32
      %12 = arith.extui %11 : i1 to i32
      %c0_i32_6 = arith.constant 0 : i32
      %13 = arith.cmpi ne, %12, %c0_i32_6 : i32
      scf.if %13 {
        %c0_14 = arith.constant 0 : index
        %c0_15 = arith.constant 0 : index
        %26 = vector.load %arg8[%c0_14, %c0_15] : memref<1x128xf32, #tpu.memory_space<vmem>>, vector<1x128xf32>
        %cst_16 = arith.constant 0.00255102036 : f32
        %27 = vector.broadcast %cst_16 : f32 to vector<1x128xf32>
        %28 = arith.mulf %26, %27 : vector<1x128xf32>
        %c0_17 = arith.constant 0 : index
        %c0_18 = arith.constant 0 : index
        %29 = vector.load %arg9[%c0_17, %c0_18] : memref<1x128xf32, #tpu.memory_space<vmem>>, vector<1x128xf32>
        %cst_19 = arith.constant 0.00255102036 : f32
        %30 = vector.broadcast %cst_19 : f32 to vector<1x128xf32>
        %31 = arith.mulf %29, %30 : vector<1x128xf32>
        %32 = arith.mulf %28, %28 : vector<1x128xf32>
        %33 = arith.subf %31, %32 : vector<1x128xf32>
        %cst_20 = arith.constant 0.000000e+00 : f32
        %34 = vector.broadcast %cst_20 : f32 to vector<1x128xf32>
        %35 = arith.maximumf %33, %34 : vector<1x128xf32>
        %c0_21 = arith.constant 0 : index
        %c0_22 = arith.constant 0 : index
        %36 = vector.load %arg4[%c0_21, %c0_22] : memref<1x128xf32, #tpu.memory_space<vmem>>, vector<1x128xf32>
        %cst_23 = arith.constant 9.99999974E-6 : f32
        %37 = vector.broadcast %cst_23 : f32 to vector<1x128xf32>
        %38 = arith.addf %35, %37 : vector<1x128xf32>
        %39 = math.rsqrt %38 : vector<1x128xf32>
        %40 = arith.mulf %36, %39 : vector<1x128xf32>
        %c0_24 = arith.constant 0 : index
        %c0_25 = arith.constant 0 : index
        %41 = vector.load %arg10[%c0_24, %c0_25] : memref<1x128xf32, #tpu.memory_space<vmem>>, vector<1x128xf32>
        tpu.vector_store %arg10[%c0_24, %c0_25], %40 {strides = array<i32>} : memref<1x128xf32, #tpu.memory_space<vmem>>, vector<1x128xf32>,
        %c0_26 = arith.constant 0 : index
        %c0_27 = arith.constant 0 : index
        %42 = vector.load %arg5[%c0_26, %c0_27] : memref<1x128xf32, #tpu.memory_space<vmem>>, vector<1x128xf32>
        %43 = arith.mulf %28, %40 : vector<1x128xf32>
        %44 = arith.subf %42, %43 : vector<1x128xf32>
        %c0_28 = arith.constant 0 : index
        %c0_29 = arith.constant 0 : index
        %45 = vector.load %arg11[%c0_28, %c0_29] : memref<1x128xf32, #tpu.memory_space<vmem>>, vector<1x128xf32>
        tpu.vector_store %arg11[%c0_28, %c0_29], %44 {strides = array<i32>} : memref<1x128xf32, #tpu.memory_space<vmem>>, vector<1x128xf32>,
      } else {
      }
      %14 = arith.index_cast %arg1 : i32 to index
      %c0 = arith.constant 0 : index
      %c0_7 = arith.constant 0 : index
      %15 = vector.load %arg7[%14, %c0, %c0_7] : memref<1x400x128xf32, #tpu.memory_space<vmem>>, vector<1x400x128xf32>
      %16 = vector.shape_cast %15 : vector<1x400x128xf32> to vector<400x128xf32>
      %c0_8 = arith.constant 0 : index
      %c0_9 = arith.constant 0 : index
      %17 = vector.load %arg10[%c0_8, %c0_9] : memref<1x128xf32, #tpu.memory_space<vmem>>, vector<1x128xf32>
      %18 = vector.broadcast %17 : vector<1x128xf32> to vector<400x128xf32>
      %19 = arith.mulf %16, %18 : vector<400x128xf32>
      %c0_10 = arith.constant 0 : index
      %c0_11 = arith.constant 0 : index
      %20 = vector.load %arg11[%c0_10, %c0_11] : memref<1x128xf32, #tpu.memory_space<vmem>>, vector<1x128xf32>
      %21 = vector.broadcast %20 : vector<1x128xf32> to vector<400x128xf32>
      %22 = arith.addf %19, %21 : vector<400x128xf32>
      %cst = arith.constant 0.000000e+00 : f32
      %23 = vector.broadcast %cst : f32 to vector<400x128xf32>
      %24 = arith.maximumf %22, %23 : vector<400x128xf32>
      %c0_12 = arith.constant 0 : index
      %c0_13 = arith.constant 0 : index
      %25 = vector.load %arg6[%c0_12, %c0_13] : memref<400x128xf32, #tpu.memory_space<vmem>>, vector<400x128xf32>
      tpu.vector_store %arg6[%c0_12, %c0_13], %24 {strides = array<i32>} : memref<400x128xf32, #tpu.memory_space<vmem>>, vector<400x128xf32>,
    } else {
    }
    return
  }
  func.func @transform_0(%arg0: i32, %arg1: i32) -> (i32, i32) {
    %c1_i32 = arith.constant 1 : i32
    %0 = arith.subi %c1_i32, %arg0 : i32
    %1 = arith.muli %0, %arg1 : i32
    %c0_i32 = arith.constant 0 : i32
    %c0_i32_0 = arith.constant 0 : i32
    return %1, %c0_i32 : i32, i32
  }
  func.func @transform_1(%arg0: i32, %arg1: i32) -> (i32, i32) {
    %c0_i32 = arith.constant 0 : i32
    %c0_i32_0 = arith.constant 0 : i32
    %c0_i32_1 = arith.constant 0 : i32
    return %c0_i32, %c0_i32_0 : i32, i32
  }
  func.func @transform_2(%arg0: i32, %arg1: i32) -> (i32, i32) {
    %c0_i32 = arith.constant 0 : i32
    %c0_i32_0 = arith.constant 0 : i32
    %c0_i32_1 = arith.constant 0 : i32
    return %c0_i32, %c0_i32_0 : i32, i32
  }
  func.func @transform_3(%arg0: i32, %arg1: i32) -> (i32, i32) {
    %c0_i32 = arith.constant 0 : i32
    %c0_i32_0 = arith.constant 0 : i32
    %c0_i32_1 = arith.constant 0 : i32
    return %c0_i32, %c0_i32_0 : i32, i32
  }
  func.func @transform_4(%arg0: i32, %arg1: i32) -> (i32, i32) {
    %0 = arith.muli %arg0, %arg1 : i32
    %c0_i32 = arith.constant 0 : i32
    %c0_i32_0 = arith.constant 0 : i32
    return %0, %c0_i32 : i32, i32
  }
}

</mosaic_0001>

<bundles_post_ra>
// kernel: tpu_custom_call.1
= control target key start
LH: loop header
LB: loop body
LE: loop exit
PB: predicated region body
PF: predicated region fallthrough
CT: control target
= control target key end

     0   :  { %9 = vsyncpa [#allocation8], 0  ;;  %s2353_s0 = inlined_call_operand.hbm [shape: bf16[400,128], index: 0, kind: input, shape index: {}]   ;;  %s2354_s1 = inlined_call_operand.hbm [shape: bf16[128,128], index: 1, kind: input, shape index: {}]   ;;  %s2355_s2 = inlined_call_operand.vmem [shape: f32[1,128], index: 2, kind: input, shape index: {}]   ;;  %s2356_s3 = inlined_call_operand.vmem [shape: f32[1,128], index: 3, kind: input, shape index: {}]   ;;  %s2357_s4 = inlined_call_operand.hbm [shape: f32[400,128], index: 4, kind: output, shape index: {}]  }
   0x1   :  { %11 = vsyncpa [#allocation8 + $0x1], 0 }
   0x2   :  { %12 = vsyncpa [#allocation11], 0 }
   0x3   :  { %13 = vsyncpa [#allocation9], 0 }
   0x4   :  { %15 = vsyncpa [#allocation9 + $0x1], 0  ;;  %s1847_s15 = smov 0   ;;  %s1849_s16 = smov 0  }
   0x5   :  { %s1851_s17 = smov 0  }
   0x6 LB: > { %s1382_s18 = sadd.s32 4294967295, %s1810_s17   ;;  %s1383_s19 = sadd.s32 4294967294, %s1810_s17   ;;  %s1810_s17 = sphi %s1851_s17, %s21_s17   ;;  %s1806_s16 = sphi %s1849_s16, %s2365_s16   ;;  %s1802_s15 = sphi %s1847_s15, %s2364_s15  }
   0x7   : > { %s33_s20 = sadd.s32 1, %s1806_s16  ;;  %p1384_p0 = scmp.ge.s32.totalorder %s1810_s17, 1 }
   0x8   : > { %p35_p1 = scmp.ge.s32.totalorder %s33_s20, 2  ;;  %p159_p2 = scmp.lt.s32.totalorder %s1810_s17, 3 }
   0x9   : > { %p1869_p3 = scmp.eq.s32.totalorder %s1382_s18, 0  ;;  %s1812_s23 = smov [#allocation10]  }
   0xa   : > { %s2367_s20 = smov (%p35_p1, %s33_s20), 0  ;;  %p1875_p4 = pnand %p1384_p0, %p159_p2 }
   0xb   : > { %s171_s24 = sshll.u32 %s1812_s23, 4  ;;  %p1386_p6 = scmp.ge.s32.totalorder %s1810_s17, 2  ;;  %s172_s24 = int_to_ptr.vmem [resolvable:$true] %s171_s24 }
   0xc   : > { %s2360_s22 = scalar_select %p1875_p4, 1, 0 }
   0xd   : > { %p1611_p5 = pneg %p1875_p4  ;;  %p1624_p8 = scmp.lt.s32.totalorder %s1810_s17, 2 }
   0xe   : > { %p1625_p9 = scmp.eq.s32.totalorder %s1810_s17, 0  ;;  %s1711_s26 = scalar_lea.vmem %s172_s24, 1024 }
   0xf   : > { %p1884_p7 = pnand %p1869_p3, %p1611_p5  ;;  %p1712_p11 = scmp.ne.s32.totalorder %s172_s24, %s1711_s26 }
  0x10   : > { %p1719_p0 = scmp.lt.s32.totalorder %s172_s24, %s172_s24  ;;  %p1720_p1 = scmp.lt.s32.totalorder %s1711_s26, %s1711_s26 }
  0x11   : > { %p1702_p10 = pneg %p1884_p7 }
  0x12   : > { %p1721_p2 = por %p1720_p1, %p1719_p0 }
  0x13   : > { %p1714_p12 = pnand %p1712_p11, %p1702_p10 }
  0x15   : > { %p1715_p13 = pneg %p1714_p12 }
  0x17   : > { %p1722_p4 = pnand %p1721_p2, %p1715_p13 }
  0x19   : > { %1725 = shalt.err (!%p1722_p4)
}
  0x1a   : > { %s1813_s27 = smov 64   ;;  %s1814_s28 = smov 4  }
  0x1b   : > { %1614 = dma.hbm_to_vmem [thread:$0]  (!%p1884_p7), %s2354_s1, 1024, %s172_s24, [#allocation11], %s1813_s27, %s1813_s27, %s1814_s28  }
  0x1c   : > { %s1815_s5 = smov [#allocation7]   ;;  %p1616_p5 = pnand %p1625_p9, %p1624_p8 }
  0x1d   : > { %s204_s6 = sshll.u32 %s1815_s5, 4  ;;  %s205_s6 = int_to_ptr.vmem [resolvable:$true] %s204_s6 }
  0x1e   : > { %p1728_p10 = pneg %p1616_p5  ;;  %s1737_s7 = scalar_lea.vmem %s205_s6, 3200 }
  0x1f   : > { %p1738_p11 = scmp.ne.s32.totalorder %s205_s6, %s1737_s7  ;;  %s1744_s8 = scalar_lea.vmem %s205_s6, 6400 }
  0x20   : > { %p1745_p13 = scmp.lt.s32.totalorder %s205_s6, %s205_s6  ;;  %p1746_p0 = scmp.lt.s32.totalorder %s1744_s8, %s1737_s7 }
  0x21   : > { %p1740_p4 = pnand %p1738_p11, %p1728_p10 }
  0x22   : > { %p1747_p1 = por %p1746_p0, %p1745_p13 }
  0x23   : > { %p1741_p12 = pneg %p1740_p4 }
  0x25   : > { %p1748_p2 = pnand %p1747_p1, %p1741_p12 }
  0x27   : > { %1751 = shalt.err (!%p1748_p2)
}
  0x28   : > { %1618 = dma.hbm_to_vmem [thread:$0]  (!%p1616_p5), %s2353_s0, 3200, %s205_s6, [#allocation8], %s1813_s27, %s1813_s27, %s1814_s28  }
  0x29   : > { %p2362_p7 = scmp.ne.s32.totalorder %s2360_s22, 0 }
  0x2b   : > { %216 = sbr.rel (%p2362_p7) target bundleno = 561 (0x231), region = 36 }
  0x30   : > { %1789 = dma.done.wait (%p1869_p3), [#allocation8], 3200  }
  0x31   : > { %1791 = vsyncadd (%p1869_p3), [#allocation8], 4294964096 }
  0x32   : > { %1793 = dma.done.wait (%p1869_p3), [#allocation11], 1024  }
  0x33   : > { %1795 = vsyncadd (%p1869_p3), [#allocation11], 4294966272  ;;  %p257_p8 = scmp.eq.s32.totalorder %s1802_s15, 0 }
  0x34   : > { %v1816_v0 = vmov (%p257_p8), 0.0  }
  0x35   : > { %262 = sbr.rel (!%p257_p8) target bundleno = 58 (0x3a), region = 48  ;;  %263 = vst [vmem:[#allocation3] sm:$0x1] (%p257_p8), %v1816_v0  ;;  %264 = vst [vmem:[#allocation4] sm:$0x1] (%p257_p8), %v1816_v0 }
  0x3a PF: > { %p1392_p9 = scmp.ne.s32.totalorder %s1802_s15, 0 }
  0x3c   : > { %267 = sbr.rel (%p1392_p9) target bundleno = 458 (0x1ca), region = 52 }
  0x41   : > { %v1665_v1 = vld [vmem:[#allocation10 + $0x38] sm:$0xff]   ;;  %v1817_v2 = vmov 0.0   ;;  %v1666_v3 = vld [vmem:[#allocation10 + $0x30] sm:$0xff]   ;;  %vm1818_vm0 = vmmov 0   ;;  %v1667_v4 = vld [vmem:[#allocation10 + $0x28] sm:$0xff]  }
  0x42   : > { %1467 = vmatprep.subr.bf16.mxu0 %v1817_v2  ;;  %1583 = vmatprep.subr.bf16.mxu1 %v1817_v2  ;;  %v1668_v5 = vld [vmem:[#allocation10 + $0x20] sm:$0xff]   ;;  %v1669_v6 = vld [vmem:[#allocation10 + $0x18] sm:$0xff]   ;;  %v1670_v7 = vld [vmem:[#allocation10 + $0x10] sm:$0xff]  }
  0x43   : > { %1468 = vmatpush3.bf16.msra.mxu0 %v1665_v1  ;;  %1483 = vmatprep.mubr.msk.bf16.mxu0 %vm1818_vm0, %v1817_v2  ;;  %v1671_v8 = vld [vmem:[#allocation10 + $0x8] sm:$0xff]   ;;  %v1672_v9 = vld [vmem:[#allocation10] sm:$0xff]   ;;  %v1673_v10 = vld [vmem:[#allocation7] sm:$0xff]  }
  0x44   : > { %1469 = vmatprep.subr.bf16.mxu0 %v1817_v2  ;;  %1591 = vmatpush3.bf16.msra.mxu1 %v1665_v1  ;;  %v1680_v11 = vld [vmem:[#allocation7 + $0x68] sm:$0xff]   ;;  %v1682_v13 = vld [vmem:[#allocation7 + $0x70] sm:$0xff]   ;;  %v1684_v15 = vld [vmem:[#allocation7 + $0x78] sm:$0xff]  }
  0x45   : > { %1584 = vmatprep.subr.bf16.mxu1 %v1817_v2  ;;  %1535 = vmatprep.mubr.msk.bf16.mxu1 %vm1818_vm0, %v1817_v2  ;;  %v1674_v12 = vld [vmem:[#allocation7 + $0x8] sm:$0xff]   ;;  %v1675_v14 = vld [vmem:[#allocation7 + $0x10] sm:$0xff]   ;;  %v1676_v16 = vld [vmem:[#allocation7 + $0x18] sm:$0xff]  }
  0x46   : > { %v1686_v17 = vld [vmem:[#allocation7 + $0x80] sm:$0xff]   ;;  %v1688_v19 = vld [vmem:[#allocation7 + $0x88] sm:$0xff]   ;;  %v1690_v21 = vld [vmem:[#allocation7 + $0x90] sm:$0xff]  }
  0x47   : > { %1470 = vmatpush3.bf16.msra.mxu0 %v1666_v3  ;;  %v1677_v18 = vld [vmem:[#allocation7 + $0x20] sm:$0xff]   ;;  %v1678_v20 = vld [vmem:[#allocation7 + $0x28] sm:$0xff]   ;;  %v1679_v22 = vld [vmem:[#allocation7 + $0x30] sm:$0xff]  }
  0x48   : > { %1471 = vmatprep.subr.bf16.mxu0 %v1817_v2  ;;  %1592 = vmatpush3.bf16.msra.mxu1 %v1666_v3  ;;  %v1692_v23 = vld [vmem:[#allocation7 + $0x98] sm:$0xff]   ;;  %v1693_v25 = vld [vmem:[#allocation7 + $0xa0] sm:$0xff]   ;;  %v1694_v27 = vld [vmem:[#allocation7 + $0xa8] sm:$0xff]  }
  0x49   : > { %1585 = vmatprep.subr.bf16.mxu1 %v1817_v2  ;;  %v1681_v24 = vld [vmem:[#allocation7 + $0x38] sm:$0xff]   ;;  %v1683_v26 = vld [vmem:[#allocation7 + $0x40] sm:$0xff]   ;;  %v1685_v28 = vld [vmem:[#allocation7 + $0x48] sm:$0xff]  }
  0x4a   : > { %v1695_v29 = vld [vmem:[#allocation7 + $0xb0] sm:$0xff]   ;;  %v1696_v31 = vld [vmem:[#allocation7 + $0xb8] sm:$0xff]   ;;  %v1697_v33 = vld [vmem:[#allocation7 + $0xc0] sm:$0xff]  }
  0x4b   : > { %1472 = vmatpush3.bf16.msra.mxu0 %v1667_v4  ;;  %v1687_v30 = vld [vmem:[#allocation7 + $0x50] sm:$0xff]   ;;  %v1689_v32 = vld [vmem:[#allocation7 + $0x58] sm:$0xff]   ;;  %v1691_v34 = vld [vmem:[#allocation7 + $0x60] sm:$0xff]  }
  0x4c   : > { %1473 = vmatprep.subr.bf16.mxu0 %v1817_v2  ;;  %1593 = vmatpush3.bf16.msra.mxu1 %v1667_v4 }
  0x4d   : > { %1586 = vmatprep.subr.bf16.mxu1 %v1817_v2 }
  0x4f   : > { %1474 = vmatpush3.bf16.msra.mxu0 %v1668_v5 }
  0x50   : > { %1475 = vmatprep.subr.bf16.mxu0 %v1817_v2  ;;  %1594 = vmatpush3.bf16.msra.mxu1 %v1668_v5 }
  0x51   : > { %1587 = vmatprep.subr.bf16.mxu1 %v1817_v2 }
  0x53   : > { %1476 = vmatpush3.bf16.msra.mxu0 %v1669_v6 }
  0x54   : > { %1477 = vmatprep.subr.bf16.mxu0 %v1817_v2  ;;  %1595 = vmatpush3.bf16.msra.mxu1 %v1669_v6 }
  0x55   : > { %1588 = vmatprep.subr.bf16.mxu1 %v1817_v2 }
  0x57   : > { %1478 = vmatpush3.bf16.msra.mxu0 %v1670_v7 }
  0x58   : > { %1479 = vmatprep.subr.bf16.mxu0 %v1817_v2  ;;  %1596 = vmatpush3.bf16.msra.mxu1 %v1670_v7 }
  0x59   : > { %1589 = vmatprep.subr.bf16.mxu1 %v1817_v2 }
  0x5b   : > { %1480 = vmatpush3.bf16.msra.mxu0 %v1671_v8 }
  0x5c   : > { %1481 = vmatprep.subr.bf16.mxu0 %v1817_v2  ;;  %1597 = vmatpush3.bf16.msra.mxu1 %v1671_v8 }
  0x5d   : > { %1590 = vmatprep.subr.bf16.mxu1 %v1817_v2 }
  0x5f   : > { %1482 = vmatpush3.bf16.msra.mxu0 %v1672_v9 }
  0x60   : > { %1598 = vmatpush3.bf16.msra.mxu1 %v1672_v9 }
  0x62   : > { %1484 = vmatmul.mubr.bf16.vlgmr.msra.gmra.mxu0 %v1673_v10 }
  0x63   : > { %1487 = vmatprep.mubr.msk.bf16.mxu0 %vm1818_vm0, %v1817_v2  ;;  %1536 = vmatmul.mubr.bf16.vlgmr.msra.gmra.mxu1 %v1680_v11 }
  0x64   : > { %1539 = vmatprep.mubr.msk.bf16.mxu1 %vm1818_vm0, %v1817_v2 }
  0x6a   : > { %1488 = vmatmul.mubr.bf16.gmra.mxu0 %v1674_v12 }
  0x6b   : > { %1491 = vmatprep.mubr.msk.bf16.mxu0 %vm1818_vm0, %v1817_v2  ;;  %1540 = vmatmul.mubr.bf16.gmra.mxu1 %v1682_v13 }
  0x6c   : > { %1543 = vmatprep.mubr.msk.bf16.mxu1 %vm1818_vm0, %v1817_v2 }
  0x72   : > { %1492 = vmatmul.mubr.bf16.gmra.mxu0 %v1675_v14 }
  0x73   : > { %1495 = vmatprep.mubr.msk.bf16.mxu0 %vm1818_vm0, %v1817_v2  ;;  %1544 = vmatmul.mubr.bf16.gmra.mxu1 %v1684_v15 }
  0x74   : > { %1547 = vmatprep.mubr.msk.bf16.mxu1 %vm1818_vm0, %v1817_v2 }
  0x7a   : > { %1496 = vmatmul.mubr.bf16.gmra.mxu0 %v1676_v16 }
  0x7b   : > { %1499 = vmatprep.mubr.msk.bf16.mxu0 %vm1818_vm0, %v1817_v2  ;;  %1548 = vmatmul.mubr.bf16.gmra.mxu1 %v1686_v17 }
  0x7c   : > { %1551 = vmatprep.mubr.msk.bf16.mxu1 %vm1818_vm0, %v1817_v2 }
  0x82   : > { %1500 = vmatmul.mubr.bf16.gmra.mxu0 %v1677_v18 }
  0x83   : > { %1503 = vmatprep.mubr.msk.bf16.mxu0 %vm1818_vm0, %v1817_v2  ;;  %1552 = vmatmul.mubr.bf16.gmra.mxu1 %v1688_v19 }
  0x84   : > { %1555 = vmatprep.mubr.msk.bf16.mxu1 %vm1818_vm0, %v1817_v2 }
  0x8a   : > { %1504 = vmatmul.mubr.bf16.gmra.mxu0 %v1678_v20 }
  0x8b   : > { %1507 = vmatprep.mubr.msk.bf16.mxu0 %vm1818_vm0, %v1817_v2  ;;  %1556 = vmatmul.mubr.bf16.gmra.mxu1 %v1690_v21 }
  0x8c   : > { %1559 = vmatprep.mubr.msk.bf16.mxu1 %vm1818_vm0, %v1817_v2 }
  0x92   : > { %1508 = vmatmul.mubr.bf16.gmra.mxu0 %v1679_v22 }
  0x93   : > { %1511 = vmatprep.mubr.msk.bf16.mxu0 %vm1818_vm0, %v1817_v2  ;;  %1560 = vmatmul.mubr.bf16.gmra.mxu1 %v1692_v23 }
  0x94   : > { %1563 = vmatprep.mubr.msk.bf16.mxu1 %vm1818_vm0, %v1817_v2 }
  0x9a   : > { %1512 = vmatmul.mubr.bf16.gmra.mxu0 %v1681_v24 }
  0x9b   : > { %1515 = vmatprep.mubr.msk.bf16.mxu0 %vm1818_vm0, %v1817_v2  ;;  %1564 = vmatmul.mubr.bf16.gmra.mxu1 %v1693_v25 }
  0x9c   : > { %1567 = vmatprep.mubr.msk.bf16.mxu1 %vm1818_vm0, %v1817_v2 }
  0xa2   : > { %1516 = vmatmul.mubr.bf16.gmra.mxu0 %v1683_v26 }
  0xa3   : > { %1519 = vmatprep.mubr.msk.bf16.mxu0 %vm1818_vm0, %v1817_v2  ;;  %1568 = vmatmul.mubr.bf16.gmra.mxu1 %v1694_v27 }
  0xa4   : > { %1571 = vmatprep.mubr.msk.bf16.mxu1 %vm1818_vm0, %v1817_v2 }
  0xaa   : > { %1520 = vmatmul.mubr.bf16.gmra.mxu0 %v1685_v28 }
  0xab   : > { %1523 = vmatprep.mubr.msk.bf16.mxu0 %vm1818_vm0, %v1817_v2  ;;  %1572 = vmatmul.mubr.bf16.gmra.mxu1 %v1695_v29 }
  0xac   : > { %1575 = vmatprep.mubr.msk.bf16.mxu1 %vm1818_vm0, %v1817_v2 }
  0xb2   : > { %1524 = vmatmul.mubr.bf16.gmra.mxu0 %v1687_v30 }
  0xb3   : > { %1527 = vmatprep.mubr.msk.bf16.mxu0 %vm1818_vm0, %v1817_v2  ;;  %1576 = vmatmul.mubr.bf16.gmra.mxu1 %v1696_v31 }
  0xb4   : > { %1579 = vmatprep.mubr.msk.bf16.mxu1 %vm1818_vm0, %v1817_v2 }
  0xba   : > { %1528 = vmatmul.mubr.bf16.gmra.mxu0 %v1689_v32 }
  0xbb   : > { %1531 = vmatprep.mubr.msk.bf16.mxu0 %vm1818_vm0, %v1817_v2  ;;  %1580 = vmatmul.mubr.bf16.gmra.mxu1 %v1697_v33 }
  0xc2   : > { %1532 = vmatmul.mubr.bf16.gmra.mxu0 %v1691_v34 }
 0x122   : > { %v1982_v35 = vpop.f32.mrf.mxu0 }
 0x123   : > { %767 = vst [vmem:[#allocation2 + $0xb0] sm:$0xff] %v1982_v35  ;;  %v1985_v36 = vpop.f32.mrf.mxu1  ;;  %v876_v25 = vmul.f32 %v1982_v35, %v1982_v35 }
 0x124   : > { %v1485_v37 = vpop.f32.mrf.mxu0  ;;  %793 = vst [vmem:[#allocation2 + $0x20] sm:$0xff] %v1985_v36 }
 0x125   : > { %v1537_v38 = vpop.f32.mrf.mxu1 }
 0x126   : > { %v1988_v39 = vpop.f32.mrf.mxu0 }
 0x127   : > { %768 = vst [vmem:[#allocation2 + $0xd0] sm:$0xff] %v1988_v39  ;;  %v1991_v40 = vpop.f32.mrf.mxu1  ;;  %v877_v22 = vmul.f32 %v1988_v39, %v1988_v39  ;;  %v818_v26 = vadd.f32 %v1988_v39, %v1982_v35 }
 0x128   : > { %v1486_v41 = vpop.f32.mrf.mxu0  ;;  %794 = vst [vmem:[#allocation2 + $0x88] sm:$0xff] %v1991_v40 }
 0x129   : > { %v1538_v42 = vpop.f32.mrf.mxu1  ;;  %v926_v30 = vadd.f32 %v877_v22, %v876_v25 }
 0x12a   : > { %v1994_v43 = vpop.f32.mrf.mxu0 }
 0x12b   : > { %769 = vst [vmem:[#allocation2 + $0x10] sm:$0xff] %v1994_v43  ;;  %v1997_v44 = vpop.f32.mrf.mxu1  ;;  %v878_v27 = vmul.f32 %v1994_v43, %v1994_v43  ;;  %v819_v31 = vadd.f32 %v818_v26, %v1994_v43 }
 0x12c   : > { %v1489_v45 = vpop.f32.mrf.mxu0  ;;  %795 = vst [vmem:[#allocation2 + $0xa0] sm:$0xff] %v1997_v44 }
 0x12d   : > { %v1541_v46 = vpop.f32.mrf.mxu1  ;;  %v927_v35 = vadd.f32 %v926_v30, %v878_v27 }
 0x12e   : > { %v2000_v47 = vpop.f32.mrf.mxu0 }
 0x12f   : > { %770 = vst [vmem:[#allocation2 + $0x48] sm:$0xff] %v2000_v47  ;;  %v2003_v48 = vpop.f32.mrf.mxu1  ;;  %v879_v32 = vmul.f32 %v2000_v47, %v2000_v47  ;;  %v820_v37 = vadd.f32 %v819_v31, %v2000_v47 }
 0x130   : > { %v1490_v49 = vpop.f32.mrf.mxu0  ;;  %796 = vst [vmem:[#allocation2 + $0x170] sm:$0xff] %v2003_v48 }
 0x131   : > { %v1542_v50 = vpop.f32.mrf.mxu1  ;;  %v928_v42 = vadd.f32 %v927_v35, %v879_v32 }
 0x132   : > { %v2006_v51 = vpop.f32.mrf.mxu0 }
 0x133   : > { %771 = vst [vmem:[#allocation2 + $0x160] sm:$0xff] %v2006_v51  ;;  %v2009_v52 = vpop.f32.mrf.mxu1  ;;  %v880_v38 = vmul.f32 %v2006_v51, %v2006_v51  ;;  %v821_v43 = vadd.f32 %v820_v37, %v2006_v51 }
 0x134   : > { %v1493_v53 = vpop.f32.mrf.mxu0  ;;  %797 = vst [vmem:[#allocation2 + $0xf0] sm:$0xff] %v2009_v52 }
 0x135   : > { %v1545_v54 = vpop.f32.mrf.mxu1  ;;  %v929_v50 = vadd.f32 %v928_v42, %v880_v38 }
 0x136   : > { %v2012_v55 = vpop.f32.mrf.mxu0 }
 0x137   : > { %772 = vst [vmem:[#allocation2 + $0x128] sm:$0xff] %v2012_v55  ;;  %v2015_v56 = vpop.f32.mrf.mxu1  ;;  %v881_v45 = vmul.f32 %v2012_v55, %v2012_v55  ;;  %v822_v47 = vadd.f32 %v821_v43, %v2012_v55 }
 0x138   : > { %v1494_v57 = vpop.f32.mrf.mxu0  ;;  %798 = vst [vmem:[#allocation2 + $0x140] sm:$0xff] %v2015_v56 }
 0x139   : > { %v1546_v58 = vpop.f32.mrf.mxu1 }
 0x13a   : > { %v2018_v59 = vpop.f32.mrf.mxu0  ;;  %v930_v58 = vadd.f32 %v929_v50, %v881_v45 }
 0x13b   : > { %773 = vst [vmem:[#allocation2 + $0x40] sm:$0xff] %v2018_v59  ;;  %v2021_v60 = vpop.f32.mrf.mxu1  ;;  %v882_v53 = vmul.f32 %v2018_v59, %v2018_v59  ;;  %v823_v51 = vadd.f32 %v822_v47, %v2018_v59 }
 0x13c   : > { %v1497_v61 = vpop.f32.mrf.mxu0  ;;  %799 = vst [vmem:[#allocation2 + $0x50] sm:$0xff] %v2021_v60 }
 0x13d   : > { %v1549_v62 = vpop.f32.mrf.mxu1 }
 0x13e   : > { %v2024_v63 = vpop.f32.mrf.mxu0 }
 0x13f   : > { %774 = vst [vmem:[#allocation2 + $0x178] sm:$0xff] %v2024_v63  ;;  %v2027_v0 = vpop.f32.mrf.mxu1  ;;  %v883_v61 = vmul.f32 %v2024_v63, %v2024_v63  ;;  %v824_v55 = vadd.f32 %v823_v51, %v2024_v63 }
 0x140   : > { %v1498_v1 = vpop.f32.mrf.mxu0  ;;  %800 = vst [vmem:[#allocation2] sm:$0xff] %v2027_v0 }
 0x141   : > { %v1550_v2 = vpop.f32.mrf.mxu1 }
 0x142   : > { %v2030_v3 = vpop.f32.mrf.mxu0  ;;  %v931_v2 = vadd.f32 %v930_v58, %v882_v53 }
 0x143   : > { %775 = vst [vmem:[#allocation2 + $0x108] sm:$0xff] %v2030_v3  ;;  %v2033_v4 = vpop.f32.mrf.mxu1  ;;  %v825_v59 = vadd.f32 %v824_v55, %v2030_v3 }
 0x144   : > { %v1501_v5 = vpop.f32.mrf.mxu0  ;;  %801 = vst [vmem:[#allocation2 + $0x8] sm:$0xff] %v2033_v4 }
 0x145   : > { %v1553_v6 = vpop.f32.mrf.mxu1  ;;  %v884_v5 = vmul.f32 %v2030_v3, %v2030_v3 }
 0x146   : > { %v2036_v7 = vpop.f32.mrf.mxu0 }
 0x147   : > { %776 = vst [vmem:[#allocation2 + $0x110] sm:$0xff] %v2036_v7  ;;  %v2039_v8 = vpop.f32.mrf.mxu1  ;;  %v826_v63 = vadd.f32 %v825_v59, %v2036_v7 }
 0x148   : > { %v1502_v9 = vpop.f32.mrf.mxu0  ;;  %802 = vst [vmem:[#allocation2 + $0xc0] sm:$0xff] %v2039_v8 }
 0x149   : > { %v1554_v10 = vpop.f32.mrf.mxu1 }
 0x14a   : > { %v2042_v11 = vpop.f32.mrf.mxu0  ;;  %v932_v10 = vadd.f32 %v931_v2, %v883_v61 }
 0x14b   : > { %777 = vst [vmem:[#allocation2 + $0x90] sm:$0xff] %v2042_v11  ;;  %v2045_v12 = vpop.f32.mrf.mxu1  ;;  %v827_v3 = vadd.f32 %v826_v63, %v2042_v11 }
 0x14c   : > { %v1505_v13 = vpop.f32.mrf.mxu0  ;;  %803 = vst [vmem:[#allocation2 + $0x98] sm:$0xff] %v2045_v12 }
 0x14d   : > { %v1557_v14 = vpop.f32.mrf.mxu1  ;;  %v885_v13 = vmul.f32 %v2036_v7, %v2036_v7 }
 0x14e   : > { %v2048_v15 = vpop.f32.mrf.mxu0 }
 0x14f   : > { %778 = vst [vmem:[#allocation2 + $0x118] sm:$0xff] %v2048_v15  ;;  %v2051_v16 = vpop.f32.mrf.mxu1  ;;  %v887_v26 = vmul.f32 %v2048_v15, %v2048_v15  ;;  %v828_v7 = vadd.f32 %v827_v3, %v2048_v15 }
 0x150   : > { %v1506_v17 = vpop.f32.mrf.mxu0  ;;  %804 = vst [vmem:[#allocation2 + $0x30] sm:$0xff] %v2051_v16 }
 0x151   : > { %v1558_v18 = vpop.f32.mrf.mxu1 }
 0x152   : > { %v2054_v19 = vpop.f32.mrf.mxu0  ;;  %v933_v18 = vadd.f32 %v932_v10, %v884_v5 }
 0x153   : > { %779 = vst [vmem:[#allocation2 + $0x148] sm:$0xff] %v2054_v19  ;;  %v2057_v20 = vpop.f32.mrf.mxu1  ;;  %v888_v31 = vmul.f32 %v2054_v19, %v2054_v19 }
 0x154   : > { %v1509_v21 = vpop.f32.mrf.mxu0  ;;  %805 = vst [vmem:[#allocation2 + $0x188] sm:$0xff] %v2057_v20  ;;  %v934_v25 = vadd.f32 %v933_v18, %v885_v13 }
 0x155   : > { %v1561_v23 = vpop.f32.mrf.mxu1  ;;  %v886_v21 = vmul.f32 %v2042_v11, %v2042_v11  ;;  %v829_v11 = vadd.f32 %v828_v7, %v2054_v19 }
 0x156   : > { %v2062_v24 = vpop.f32.mrf.mxu0 }
 0x157   : > { %780 = vst [vmem:[#allocation2 + $0x100] sm:$0xff] %v2062_v24  ;;  %v2071_v28 = vpop.f32.mrf.mxu1  ;;  %v935_v30 = vadd.f32 %v934_v25, %v886_v21  ;;  %v889_v37 = vmul.f32 %v2062_v24, %v2062_v24  ;;  %v830_v15 = vadd.f32 %v829_v11, %v2062_v24 }
 0x158   : > { %v1510_v29 = vpop.f32.mrf.mxu0  ;;  %806 = vst [vmem:[#allocation2 + $0x18] sm:$0xff] %v2071_v28 }
 0x159   : > { %v1562_v33 = vpop.f32.mrf.mxu1  ;;  %v936_v35 = vadd.f32 %v935_v30, %v887_v26 }
 0x15a   : > { %v2077_v34 = vpop.f32.mrf.mxu0 }
 0x15b   : > { %781 = vst [vmem:[#allocation2 + $0x58] sm:$0xff] %v2077_v34  ;;  %v2083_v39 = vpop.f32.mrf.mxu1  ;;  %v937_v42 = vadd.f32 %v936_v35, %v888_v31  ;;  %v890_v43 = vmul.f32 %v2077_v34, %v2077_v34  ;;  %v831_v19 = vadd.f32 %v830_v15, %v2077_v34 }
 0x15c   : > { %v1513_v41 = vpop.f32.mrf.mxu0  ;;  %807 = vst [vmem:[#allocation2 + $0x28] sm:$0xff] %v2083_v39 }
 0x15d   : > { %v1565_v46 = vpop.f32.mrf.mxu1  ;;  %v938_v50 = vadd.f32 %v937_v42, %v889_v37 }
 0x15e   : > { %v625_v49 = vpop.f32.mrf.mxu0 }
 0x15f   : > { %782 = vst [vmem:[#allocation2 + $0xd8] sm:$0xff] %v625_v49  ;;  %v2092_v54 = vpop.f32.mrf.mxu1  ;;  %v891_v47 = vmul.f32 %v625_v49, %v625_v49  ;;  %v939_v58 = vadd.f32 %v938_v50, %v890_v43  ;;  %v832_v51 = vadd.f32 %v831_v19, %v625_v49 }
 0x160   : > { %v1514_v57 = vpop.f32.mrf.mxu0  ;;  %808 = vst [vmem:[#allocation2 + $0x158] sm:$0xff] %v2092_v54 }
 0x161   : > { %v1566_v62 = vpop.f32.mrf.mxu1  ;;  %v940_v2 = vadd.f32 %v939_v58, %v891_v47 }
 0x162   : > { %v630_v1 = vpop.f32.mrf.mxu0 }
 0x163   : > { %783 = vst [vmem:[#allocation2 + $0x180] sm:$0xff] %v630_v1  ;;  %v2101_v6 = vpop.f32.mrf.mxu1  ;;  %v892_v61 = vmul.f32 %v630_v1, %v630_v1  ;;  %v833_v55 = vadd.f32 %v832_v51, %v630_v1 }
 0x164   : > { %v1517_v9 = vpop.f32.mrf.mxu0  ;;  %809 = vst [vmem:[#allocation2 + $0x38] sm:$0xff] %v2101_v6 }
 0x165   : > { %v1569_v14 = vpop.f32.mrf.mxu1  ;;  %v941_v59 = vadd.f32 %v940_v2, %v892_v61 }
 0x166   : > { %v633_v17 = vpop.f32.mrf.mxu0 }
 0x167   : > { %784 = vst [vmem:[#allocation2 + $0x130] sm:$0xff] %v633_v17  ;;  %v2110_v22 = vpop.f32.mrf.mxu1  ;;  %v893_v5 = vmul.f32 %v633_v17, %v633_v17  ;;  %v834_v13 = vadd.f32 %v833_v55, %v633_v17 }
 0x168   : > { %v1518_v23 = vpop.f32.mrf.mxu0  ;;  %810 = vst [vmem:[#allocation2 + $0x70] sm:$0xff] %v2110_v22 }
 0x169   : > { %v1570_v27 = vpop.f32.mrf.mxu1  ;;  %v942_v49 = vadd.f32 %v941_v59, %v893_v5 }
 0x16a   : > { %v638_v29 = vpop.f32.mrf.mxu0 }
 0x16b   : > { %785 = vst [vmem:[#allocation2 + $0x138] sm:$0xff] %v638_v29  ;;  %v2119_v32 = vpop.f32.mrf.mxu1  ;;  %v894_v34 = vmul.f32 %v638_v29, %v638_v29  ;;  %v835_v63 = vadd.f32 %v834_v13, %v638_v29  ;;  %v903_v13 = vmul.f32 %v1991_v40, %v1991_v40 }
 0x16c   : > { %v1521_v33 = vpop.f32.mrf.mxu0  ;;  %811 = vst [vmem:[#allocation2 + $0x68] sm:$0xff] %v2119_v32 }
 0x16d   : > { %v1573_v38 = vpop.f32.mrf.mxu1  ;;  %v943_v3 = vadd.f32 %v942_v49, %v894_v34  ;;  %v904_v49 = vmul.f32 %v1997_v44, %v1997_v44 }
 0x16e   : > { %v641_v41 = vpop.f32.mrf.mxu0 }
 0x16f   : > { %786 = vst [vmem:[#allocation2 + $0x120] sm:$0xff] %v641_v41  ;;  %v2128_v45 = vpop.f32.mrf.mxu1  ;;  %v895_v21 = vmul.f32 %v641_v41, %v641_v41  ;;  %v836_v26 = vadd.f32 %v835_v63, %v641_v41 }
 0x170   : > { %v1522_v46 = vpop.f32.mrf.mxu0  ;;  %812 = vst [vmem:[#allocation2 + $0x80] sm:$0xff] %v2128_v45 }
 0x171   : > { %v1574_v53 = vpop.f32.mrf.mxu1  ;;  %v944_v17 = vadd.f32 %v943_v3, %v895_v21 }
 0x172   : > { %v646_v57 = vpop.f32.mrf.mxu0 }
 0x173   : > { %787 = vst [vmem:[#allocation2 + $0xe0] sm:$0xff] %v646_v57  ;;  %v2132_v24 = vpop.f32.mrf.mxu1  ;;  %v896_v1 = vmul.f32 %v646_v57, %v646_v57  ;;  %v837_v7 = vadd.f32 %v836_v26, %v646_v57 }
 0x174   : > { %v1525_v62 = vpop.f32.mrf.mxu0  ;;  %813 = vst [vmem:[#allocation2 + $0xc8] sm:$0xff] %v2132_v24 }
 0x175   : > { %v1577_v9 = vpop.f32.mrf.mxu1  ;;  %v945_v11 = vadd.f32 %v944_v17, %v896_v1 }
 0x176   : > { %v649_v10 = vpop.f32.mrf.mxu0  ;;  %v902_v9 = vmul.f32 %v1985_v36, %v1985_v36 }
 0x177   : > { %788 = vst [vmem:[#allocation2 + $0xa8] sm:$0xff] %v649_v10  ;;  %v2135_v14 = vpop.f32.mrf.mxu1  ;;  %v897_v31 = vmul.f32 %v649_v10, %v649_v10  ;;  %v838_v37 = vadd.f32 %v837_v7, %v649_v10 }
 0x178   : > { %v1526_v18 = vpop.f32.mrf.mxu0  ;;  %814 = vst [vmem:[#allocation2 + $0x60] sm:$0xff] %v2135_v14 }
 0x179   : > { %v1578_v23 = vpop.f32.mrf.mxu1  ;;  %v946_v41 = vadd.f32 %v945_v11, %v897_v31 }
 0x17a   : > { %v654_v25 = vpop.f32.mrf.mxu0  ;;  %v905_v23 = vmul.f32 %v2003_v48, %v2003_v48 }
 0x17b   : > { %789 = vst [vmem:[#allocation2 + $0xb8] sm:$0xff] %v654_v25  ;;  %v2138_v27 = vpop.f32.mrf.mxu1  ;;  %v898_v29 = vmul.f32 %v654_v25, %v654_v25  ;;  %v839_v15 = vadd.f32 %v838_v37, %v654_v25 }
 0x17c   : > { %v1529_v30 = vpop.f32.mrf.mxu0  ;;  %815 = vst [vmem:[#allocation2 + $0x78] sm:$0xff] %v2138_v27 }
 0x17d   : > { %v1581_v33 = vpop.f32.mrf.mxu1  ;;  %v947_v19 = vadd.f32 %v946_v41, %v898_v29 }
 0x17e   : > { %v657_v35 = vpop.f32.mrf.mxu0 }
 0x17f   : > { %790 = vst [vmem:[#allocation2 + $0x168] sm:$0xff] %v657_v35  ;;  %v2141_v38 = vpop.f32.mrf.mxu1  ;;  %v899_v43 = vmul.f32 %v657_v35, %v657_v35  ;;  %v840_v47 = vadd.f32 %v839_v15, %v657_v35 }
 0x180   : > { %v1530_v42 = vpop.f32.mrf.mxu0  ;;  %816 = vst [vmem:[#allocation2 + $0x150] sm:$0xff] %v2141_v38 }
 0x181   : > { %v1582_v46 = vpop.f32.mrf.mxu1  ;;  %v948_v58 = vadd.f32 %v947_v19, %v899_v43 }
 0x182   : > { %v662_v50 = vpop.f32.mrf.mxu0 }
 0x183   : > { %791 = vst [vmem:[#allocation2 + $0xe8] sm:$0xff] %v662_v50  ;;  %v900_v53 = vmul.f32 %v662_v50, %v662_v50  ;;  %v841_v51 = vadd.f32 %v840_v47, %v662_v50  ;;  %v915_v47 = vmul.f32 %v2071_v28, %v2071_v28 }
 0x184   : > { %v1533_v57 = vpop.f32.mrf.mxu0 }
 0x185   : > { %v949_v62 = vadd.f32 %v948_v58, %v900_v53  ;;  %v916_v58 = vmul.f32 %v2083_v39, %v2083_v39 }
 0x186   : > { %v665_v61 = vpop.f32.mrf.mxu0 }
 0x187   : > { %792 = vst [vmem:[#allocation2 + $0xf8] sm:$0xff] %v665_v61  ;;  %v842_v2 = vadd.f32 %v841_v51, %v665_v61  ;;  %v901_v55 = vmul.f32 %v665_v61, %v665_v61  ;;  %v917_v61 = vmul.f32 %v2092_v54, %v2092_v54 }
 0x188   : > { %v1534_v5 = vpop.f32.mrf.mxu0 }
 0x189   : > { %v843_v10 = vadd.f32 %v842_v2, %v1985_v36  ;;  %v950_v59 = vadd.f32 %v949_v62, %v901_v55  ;;  %v906_v36 = vmul.f32 %v2009_v52, %v2009_v52  ;;  %v918_v2 = vmul.f32 %v2101_v6, %v2101_v6 }
 0x18a   : > { %v919_v5 = vmul.f32 %v2110_v22, %v2110_v22 }
 0x18b   : > { %v844_v34 = vadd.f32 %v843_v10, %v1991_v40  ;;  %v951_v18 = vadd.f32 %v950_v59, %v902_v9  ;;  %v907_v40 = vmul.f32 %v2015_v56, %v2015_v56  ;;  %v920_v10 = vmul.f32 %v2119_v32, %v2119_v32 }
 0x18d   : > { %v845_v63 = vadd.f32 %v844_v34, %v1997_v44  ;;  %v952_v21 = vadd.f32 %v951_v18, %v903_v13  ;;  %v908_v44 = vmul.f32 %v2021_v60, %v2021_v60  ;;  %v921_v13 = vmul.f32 %v2128_v45, %v2128_v45 }
 0x18e   : > { %v922_v18 = vmul.f32 %v2132_v24, %v2132_v24 }
 0x18f   : > { %v846_v25 = vadd.f32 %v845_v63, %v2003_v48  ;;  %v953_v3 = vadd.f32 %v952_v21, %v904_v49  ;;  %v909_v48 = vmul.f32 %v2027_v0, %v2027_v0  ;;  %v923_v63 = vmul.f32 %v2135_v14, %v2135_v14 }
 0x191   : > { %v847_v26 = vadd.f32 %v846_v25, %v2009_v52  ;;  %v954_v1 = vadd.f32 %v953_v3, %v905_v23  ;;  %v910_v52 = vmul.f32 %v2033_v4, %v2033_v4  ;;  %v924_v23 = vmul.f32 %v2138_v27, %v2138_v27 }
 0x192   : > { %v925_v3 = vmul.f32 %v2141_v38, %v2141_v38 }
 0x193   : > { %v848_v30 = vadd.f32 %v847_v26, %v2015_v56  ;;  %v955_v17 = vadd.f32 %v954_v1, %v906_v36  ;;  %v911_v56 = vmul.f32 %v2039_v8, %v2039_v8 }
 0x195   : > { %v956_v7 = vadd.f32 %v955_v17, %v907_v40  ;;  %v849_v31 = vadd.f32 %v848_v30, %v2021_v60  ;;  %v912_v60 = vmul.f32 %v2045_v12, %v2045_v12 }
 0x197   : > { %v850_v33 = vadd.f32 %v849_v31, %v2027_v0  ;;  %v957_v35 = vadd.f32 %v956_v7, %v908_v44  ;;  %v913_v0 = vmul.f32 %v2051_v16, %v2051_v16  ;;  %v817_v31 = vld [vmem:[#allocation3] sm:$0x1] }
 0x199   : > { %v851_v11 = vadd.f32 %v850_v33, %v2033_v4  ;;  %v958_v37 = vadd.f32 %v957_v35, %v909_v48  ;;  %v914_v4 = vmul.f32 %v2057_v20, %v2057_v20 }
 0x19b   : > { %v852_v29 = vadd.f32 %v851_v11, %v2039_v8  ;;  %v959_v42 = vadd.f32 %v958_v37, %v910_v52 }
 0x19d   : > { %v853_v41 = vadd.f32 %v852_v29, %v2045_v12  ;;  %v960_v15 = vadd.f32 %v959_v42, %v911_v56 }
 0x19f   : > { %v854_v43 = vadd.f32 %v853_v41, %v2051_v16  ;;  %v961_v46 = vadd.f32 %v960_v15, %v912_v60 }
 0x1a1   : > { %v855_v50 = vadd.f32 %v854_v43, %v2057_v20  ;;  %v962_v19 = vadd.f32 %v961_v46, %v913_v0 }
 0x1a3   : > { %v856_v8 = vadd.f32 %v855_v50, %v2071_v28  ;;  %v963_v53 = vadd.f32 %v962_v19, %v914_v4 }
 0x1a5   : > { %v964_v12 = vadd.f32 %v963_v53, %v915_v47  ;;  %v857_v57 = vadd.f32 %v856_v8, %v2083_v39 }
 0x1a7   : > { %v965_v16 = vadd.f32 %v964_v12, %v916_v58  ;;  %v858_v51 = vadd.f32 %v857_v57, %v2092_v54 }
 0x1a9   : > { %v966_v20 = vadd.f32 %v965_v16, %v917_v61  ;;  %v859_v62 = vadd.f32 %v858_v51, %v2101_v6 }
 0x1ab   : > { %v967_v28 = vadd.f32 %v966_v20, %v918_v2  ;;  %v860_v55 = vadd.f32 %v859_v62, %v2110_v22 }
 0x1ad   : > { %v968_v9 = vadd.f32 %v967_v28, %v919_v5  ;;  %v861_v39 = vadd.f32 %v860_v55, %v2119_v32 }
 0x1af   : > { %v969_v59 = vadd.f32 %v968_v9, %v920_v10  ;;  %v862_v54 = vadd.f32 %v861_v39, %v2128_v45 }
 0x1b1   : > { %v970_v34 = vadd.f32 %v969_v59, %v921_v13  ;;  %v863_v6 = vadd.f32 %v862_v54, %v2132_v24 }
 0x1b3   : > { %v971_v49 = vadd.f32 %v970_v34, %v922_v18  ;;  %v864_v22 = vadd.f32 %v863_v6, %v2135_v14 }
 0x1b5   : > { %v972_v21 = vadd.f32 %v971_v49, %v923_v63  ;;  %v865_v32 = vadd.f32 %v864_v22, %v2138_v27  ;;  %v875_v27 = vld [vmem:[#allocation4] sm:$0x1] }
 0x1b7   : > { %v973_v25 = vadd.f32 %v972_v21, %v924_v23  ;;  %v866_v45 = vadd.f32 %v865_v32, %v2141_v38 }
 0x1b9   : > { %v867_v36 = vrot.slane %v866_v45, 4  ;;  %v974_v24 = vadd.f32 %v973_v25, %v925_v3 }
 0x1bb   : > { %v868_v26 = vadd.f32 %v867_v36, %v866_v45  ;;  %v975_v1 = vrot.slane %v974_v24, 4 }
 0x1bd   : > { %v869_v40 = vrot.slane %v868_v26, 2  ;;  %v976_v30 = vadd.f32 %v975_v1, %v974_v24 }
 0x1bf   : > { %v870_v17 = vadd.f32 %v869_v40, %v868_v26  ;;  %v977_v14 = vrot.slane %v976_v30, 2 }
 0x1c1   : > { %v871_v44 = vrot.slane %v870_v17, 1  ;;  %v978_v7 = vadd.f32 %v977_v14, %v976_v30 }
 0x1c3   : > { %v872_v48 = vadd.f32 %v871_v44, %v870_v17  ;;  %v979_v33 = vrot.slane %v978_v7, 1 }
 0x1c5   : > { %v873_v35 = vadd.f32 %v872_v48, %v817_v31  ;;  %v980_v52 = vadd.f32 %v979_v33, %v978_v7 }
 0x1c7   : > { %874 = vst [vmem:[#allocation3] sm:$0x1] %v873_v35  ;;  %v981_v11 = vadd.f32 %v980_v52, %v875_v27 }
 0x1c9   : > { %982 = vst [vmem:[#allocation4] sm:$0x1] %v981_v11 }
 0x1ca PF: > { %p1426_p3 = scmp.ne.s32.totalorder %s1802_s15, 1 }
 0x1cc   : > { %986 = sbr.rel (%p1426_p3) target bundleno = 547 (0x223), region = 56 }
 0x1d1   : > { %v990_v38 = vld [vmem:[#allocation3] sm:$0x1]  ;;  %v992_v37 = vld [vmem:[#allocation4] sm:$0x1]  ;;  %v997_v0 = vld [vmem:[%s2355_s2] sm:$0x1] }
 0x1d2   : > { %v991_v56 = vmul.f32 0.0025510204, %v990_v38  ;;  %v993_v29 = vmul.f32 0.0025510204, %v992_v37  ;;  %v1002_v4 = vld [vmem:[%s2356_s3] sm:$0x1] }
 0x1d3   : > { %v1008_v8 = vld [vmem:[#allocation2 + $0xb0] sm:$0xff]  ;;  %v1011_v12 = vld [vmem:[#allocation2 + $0x48] sm:$0xff]  ;;  %v1012_v57 = vld [vmem:[#allocation2 + $0x160] sm:$0xff] }
 0x1d4   : > { %v994_v42 = vmul.f32 %v991_v56, %v991_v56  ;;  %v1009_v47 = vld [vmem:[#allocation2 + $0xd0] sm:$0xff]  ;;  %v1013_v58 = vld [vmem:[#allocation2 + $0x128] sm:$0xff]  ;;  %v1014_v16 = vld [vmem:[#allocation2 + $0x40] sm:$0xff] }
 0x1d5   : > { %v1010_v53 = vld [vmem:[#allocation2 + $0x10] sm:$0xff]  ;;  %v1015_v51 = vld [vmem:[#allocation2 + $0x178] sm:$0xff]  ;;  %v1016_v61 = vld [vmem:[#allocation2 + $0x108] sm:$0xff] }
 0x1d6   : > { %v995_v60 = vsub.f32 %v993_v29, %v994_v42  ;;  %v1017_v20 = vld [vmem:[#allocation2 + $0x110] sm:$0xff]  ;;  %v1019_v28 = vld [vmem:[#allocation2 + $0x118] sm:$0xff]  ;;  %v1020_v55 = vld [vmem:[#allocation2 + $0x148] sm:$0xff] }
 0x1d7   : > { %v1018_v62 = vld [vmem:[#allocation2 + $0x90] sm:$0xff]  ;;  %v1021_v59 = vld [vmem:[#allocation2 + $0x100] sm:$0xff]  ;;  %v1022_v54 = vld [vmem:[#allocation2 + $0x58] sm:$0xff] }
 0x1d8   : > { %v996_v41 = vmax.f32 %v995_v60, 0.0  ;;  %v1023_v13 = vld [vmem:[#allocation2 + $0xd8] sm:$0xff]  ;;  %v1024_v42 = vld [vmem:[#allocation2 + $0x180] sm:$0xff]  ;;  %v1025_v60 = vld [vmem:[#allocation2 + $0x130] sm:$0xff] }
 0x1da   : > { %v998_v15 = vadd.f32 1e-05, %v996_v41  ;;  %v1026_v41 = vld [vmem:[#allocation2 + $0x138] sm:$0xff] }
 0x1dc   : > { %1698 = vrsqrt.f32 %v998_v15 }
 0x1e9   : > { %v1699_v43 = vpop.eup %1698 }
 0x1ea   : > { %v1000_v46 = vmul.f32 %v1699_v43, %v997_v0 }
 0x1ec   : > { %1001 = vst [vmem:[#allocation5] sm:$0x1] %v1000_v46  ;;  %v1003_v50 = vmul.f32 %v1000_v46, %v991_v56 }
 0x1ee   : > { %v1004_v19 = vsub.f32 %v1002_v4, %v1003_v50  ;;  %v1027_v4 = vld [vmem:[#allocation2 + $0x120] sm:$0xff] }
 0x1ef   : > { %v1028_v50 = vld [vmem:[#allocation2 + $0xe0] sm:$0xff] }
 0x1f0   : > { %1005 = vst [vmem:[#allocation6] sm:$0x1] %v1004_v19  ;;  %v1029_v19 = vld [vmem:[#allocation2 + $0xa8] sm:$0xff] }
 0x1f3   : > { %v2223_v2 = vld [vmem:[#allocation5] ss:$0 sm:$0xff] }
 0x1f4   : > { %v1065_v5 = vmul.f32 %v2223_v2, %v1008_v8  ;;  %v1066_v9 = vmul.f32 %v2223_v2, %v1009_v47  ;;  %v1067_v39 = vmul.f32 %v2223_v2, %v1010_v53  ;;  %v1068_v10 = vmul.f32 %v2223_v2, %v1011_v12 }
 0x1f5   : > { %v1069_v34 = vmul.f32 %v2223_v2, %v1012_v57  ;;  %v1070_v6 = vmul.f32 %v2223_v2, %v1013_v58  ;;  %v1071_v18 = vmul.f32 %v2223_v2, %v1014_v16  ;;  %v1072_v49 = vmul.f32 %v2223_v2, %v1015_v51  ;;  %v1030_v57 = vld [vmem:[#allocation2 + $0xb8] sm:$0xff]  ;;  %v1031_v58 = vld [vmem:[#allocation2 + $0x168] sm:$0xff] }
 0x1f6   : > { %v1073_v22 = vmul.f32 %v2223_v2, %v1016_v61  ;;  %v1074_v63 = vmul.f32 %v2223_v2, %v1017_v20  ;;  %v1075_v21 = vmul.f32 %v2223_v2, %v1018_v62  ;;  %v1076_v32 = vmul.f32 %v2223_v2, %v1019_v28 }
 0x1f7   : > { %v2237_v23 = vld [vmem:[#allocation6] ss:$0 sm:$0xff]  ;;  %v1077_v25 = vmul.f32 %v2223_v2, %v1020_v55  ;;  %v1078_v45 = vmul.f32 %v2223_v2, %v1021_v59  ;;  %v1079_v3 = vmul.f32 %v2223_v2, %v1022_v54  ;;  %v1080_v36 = vmul.f32 %v2223_v2, %v1023_v13 }
 0x1f8   : > { %v1122_v24 = vadd.f32 %v2237_v23, %v1065_v5  ;;  %v1123_v26 = vadd.f32 %v2237_v23, %v1066_v9  ;;  %v1124_v1 = vadd.f32 %v2237_v23, %v1067_v39  ;;  %v1125_v40 = vadd.f32 %v2237_v23, %v1068_v10 }
 0x1f9   : > { %v1126_v30 = vadd.f32 %v2237_v23, %v1069_v34  ;;  %v1127_v17 = vadd.f32 %v2237_v23, %v1070_v6  ;;  %v1128_v14 = vadd.f32 %v2237_v23, %v1071_v18  ;;  %v1129_v44 = vadd.f32 %v2237_v23, %v1072_v49  ;;  %v1032_v18 = vld [vmem:[#allocation2 + $0xe8] sm:$0xff]  ;;  %v1033_v49 = vld [vmem:[#allocation2 + $0xf8] sm:$0xff] }
 0x1fa   : > { %v1172_v7 = vmax.f32 %v1122_v24, 0.0  ;;  %v1173_v31 = vmax.f32 %v1123_v26, 0.0  ;;  %v1174_v48 = vmax.f32 %v1124_v1, 0.0  ;;  %v1175_v33 = vmax.f32 %v1125_v40, 0.0 }
 0x1fb   : > { %v1176_v27 = vmax.f32 %v1126_v30, 0.0  ;;  %v1177_v35 = vmax.f32 %v1127_v17, 0.0  ;;  %v1178_v52 = vmax.f32 %v1128_v14, 0.0  ;;  %v1179_v11 = vmax.f32 %v1129_v44, 0.0  ;;  %v1038_v30 = vld [vmem:[#allocation2 + $0xf0] sm:$0xff]  ;;  %v1039_v17 = vld [vmem:[#allocation2 + $0x140] sm:$0xff] }
 0x1fc   : > { %1222 = vst [vmem:[#allocation12] sm:$0xff] %v1172_v7  ;;  %1223 = vst [vmem:[#allocation12 + $0x8] sm:$0xff] %v1173_v31  ;;  %v1130_v38 = vadd.f32 %v2237_v23, %v1073_v22  ;;  %v1131_v37 = vadd.f32 %v2237_v23, %v1074_v63  ;;  %v1132_v56 = vadd.f32 %v2237_v23, %v1075_v21  ;;  %v1034_v22 = vld [vmem:[#allocation2 + $0x20] sm:$0xff] }
 0x1fd   : > { %1224 = vst [vmem:[#allocation12 + $0x10] sm:$0xff] %v1174_v48  ;;  %1225 = vst [vmem:[#allocation12 + $0x18] sm:$0xff] %v1175_v33  ;;  %v1133_v29 = vadd.f32 %v2237_v23, %v1076_v32  ;;  %v1134_v15 = vadd.f32 %v2237_v23, %v1077_v25  ;;  %v1135_v0 = vadd.f32 %v2237_v23, %v1078_v45  ;;  %v1035_v45 = vld [vmem:[#allocation2 + $0x88] sm:$0xff] }
 0x1fe   : > { %1226 = vst [vmem:[#allocation12 + $0x20] sm:$0xff] %v1176_v27  ;;  %1227 = vst [vmem:[#allocation12 + $0x28] sm:$0xff] %v1177_v35  ;;  %v1136_v43 = vadd.f32 %v2237_v23, %v1079_v3  ;;  %v1137_v46 = vadd.f32 %v2237_v23, %v1080_v36  ;;  %v1180_v8 = vmax.f32 %v1130_v38, 0.0  ;;  %v1181_v47 = vmax.f32 %v1131_v37, 0.0  ;;  %v1036_v3 = vld [vmem:[#allocation2 + $0xa0] sm:$0xff]  ;;  %v1037_v36 = vld [vmem:[#allocation2 + $0x170] sm:$0xff] }
 0x1ff   : > { %1228 = vst [vmem:[#allocation12 + $0x30] sm:$0xff] %v1178_v52  ;;  %1229 = vst [vmem:[#allocation12 + $0x38] sm:$0xff] %v1179_v11  ;;  %v1182_v53 = vmax.f32 %v1132_v56, 0.0  ;;  %v1183_v12 = vmax.f32 %v1133_v29, 0.0  ;;  %v1184_v16 = vmax.f32 %v1134_v15, 0.0  ;;  %v1185_v51 = vmax.f32 %v1135_v0, 0.0 }
 0x200   : > { %v1186_v61 = vmax.f32 %v1136_v43, 0.0  ;;  %v1187_v20 = vmax.f32 %v1137_v46, 0.0  ;;  %1230 = vst [vmem:[#allocation12 + $0x40] sm:$0xff] %v1180_v8  ;;  %1231 = vst [vmem:[#allocation12 + $0x48] sm:$0xff] %v1181_v47  ;;  %v1081_v62 = vmul.f32 %v2223_v2, %v1024_v42  ;;  %v1082_v28 = vmul.f32 %v2223_v2, %v1025_v60  ;;  %v1041_v15 = vld [vmem:[#allocation2] sm:$0xff]  ;;  %v1042_v0 = vld [vmem:[#allocation2 + $0x8] sm:$0xff] }
 0x201   : > { %1232 = vst [vmem:[#allocation12 + $0x50] sm:$0xff] %v1182_v53  ;;  %1233 = vst [vmem:[#allocation12 + $0x58] sm:$0xff] %v1183_v12  ;;  %v1083_v55 = vmul.f32 %v2223_v2, %v1026_v41  ;;  %v1084_v5 = vmul.f32 %v2223_v2, %v1027_v4  ;;  %v1085_v9 = vmul.f32 %v2223_v2, %v1028_v50  ;;  %v1040_v41 = vld [vmem:[#allocation2 + $0x50] sm:$0xff]  ;;  %v1044_v8 = vld [vmem:[#allocation2 + $0x98] sm:$0xff] }
 0x202   : > { %1234 = vst [vmem:[#allocation12 + $0x60] sm:$0xff] %v1184_v16  ;;  %1235 = vst [vmem:[#allocation12 + $0x68] sm:$0xff] %v1185_v51  ;;  %v1086_v39 = vmul.f32 %v2223_v2, %v1029_v19  ;;  %v1087_v10 = vmul.f32 %v2223_v2, %v1030_v57  ;;  %v1088_v59 = vmul.f32 %v2223_v2, %v1031_v58  ;;  %v1043_v19 = vld [vmem:[#allocation2 + $0xc0] sm:$0xff]  ;;  %v1045_v47 = vld [vmem:[#allocation2 + $0x30] sm:$0xff] }
 0x203   : > { %1236 = vst [vmem:[#allocation12 + $0x70] sm:$0xff] %v1186_v61  ;;  %1237 = vst [vmem:[#allocation12 + $0x78] sm:$0xff] %v1187_v20  ;;  %v1138_v54 = vadd.f32 %v2237_v23, %v1081_v62  ;;  %v1139_v13 = vadd.f32 %v2237_v23, %v1082_v28  ;;  %v1140_v34 = vadd.f32 %v2237_v23, %v1083_v55  ;;  %v1046_v16 = vld [vmem:[#allocation2 + $0x188] sm:$0xff]  ;;  %v1047_v51 = vld [vmem:[#allocation2 + $0x18] sm:$0xff] }
 0x204   : > { %v1141_v6 = vadd.f32 %v2237_v23, %v1084_v5  ;;  %v1142_v63 = vadd.f32 %v2237_v23, %v1085_v9  ;;  %v1143_v21 = vadd.f32 %v2237_v23, %v1086_v39  ;;  %v1144_v32 = vadd.f32 %v2237_v23, %v1087_v10 }
 0x205   : > { %v1145_v25 = vadd.f32 %v2237_v23, %v1088_v59  ;;  %v1188_v24 = vmax.f32 %v1138_v54, 0.0  ;;  %v1189_v26 = vmax.f32 %v1139_v13, 0.0  ;;  %v1190_v1 = vmax.f32 %v1140_v34, 0.0 }
 0x206   : > { %v1191_v40 = vmax.f32 %v1141_v6, 0.0  ;;  %v1192_v14 = vmax.f32 %v1142_v63, 0.0  ;;  %v1193_v44 = vmax.f32 %v1143_v21, 0.0  ;;  %v1194_v7 = vmax.f32 %v1144_v32, 0.0  ;;  %v1049_v63 = vld [vmem:[#allocation2 + $0x158] sm:$0xff] }
 0x207   : > { %v1195_v31 = vmax.f32 %v1145_v25, 0.0  ;;  %1238 = vst [vmem:[#allocation12 + $0x80] sm:$0xff] %v1188_v24  ;;  %1239 = vst [vmem:[#allocation12 + $0x88] sm:$0xff] %v1189_v26  ;;  %v1089_v48 = vmul.f32 %v2223_v2, %v1032_v18  ;;  %v1090_v33 = vmul.f32 %v2223_v2, %v1033_v49  ;;  %v1091_v27 = vmul.f32 %v2223_v2, %v1034_v22  ;;  %v1048_v22 = vld [vmem:[#allocation2 + $0x28] sm:$0xff]  ;;  %v1050_v21 = vld [vmem:[#allocation2 + $0x38] sm:$0xff] }
 0x208   : > { %1240 = vst [vmem:[#allocation12 + $0x90] sm:$0xff] %v1190_v1  ;;  %1241 = vst [vmem:[#allocation12 + $0x98] sm:$0xff] %v1191_v40  ;;  %v1092_v35 = vmul.f32 %v2223_v2, %v1035_v45  ;;  %v1093_v52 = vmul.f32 %v2223_v2, %v1036_v3  ;;  %v1094_v11 = vmul.f32 %v2223_v2, %v1037_v36  ;;  %v1051_v36 = vld [vmem:[#allocation2 + $0x70] sm:$0xff]  ;;  %v1052_v24 = vld [vmem:[#allocation2 + $0x68] sm:$0xff] }
 0x209   : > { %1242 = vst [vmem:[#allocation12 + $0xa0] sm:$0xff] %v1192_v14  ;;  %1243 = vst [vmem:[#allocation12 + $0xa8] sm:$0xff] %v1193_v44  ;;  %v1095_v38 = vmul.f32 %v2223_v2, %v1038_v30  ;;  %v1096_v37 = vmul.f32 %v2223_v2, %v1039_v17  ;;  %v1146_v56 = vadd.f32 %v2237_v23, %v1089_v48  ;;  %v1053_v26 = vld [vmem:[#allocation2 + $0x80] sm:$0xff]  ;;  %v1054_v14 = vld [vmem:[#allocation2 + $0xc8] sm:$0xff] }
 0x20a   : > { %1244 = vst [vmem:[#allocation12 + $0xb0] sm:$0xff] %v1194_v7  ;;  %1245 = vst [vmem:[#allocation12 + $0xb8] sm:$0xff] %v1195_v31  ;;  %v1147_v29 = vadd.f32 %v2237_v23, %v1090_v33  ;;  %v1148_v42 = vadd.f32 %v2237_v23, %v1091_v27  ;;  %v1149_v60 = vadd.f32 %v2237_v23, %v1092_v35  ;;  %v1055_v44 = vld [vmem:[#allocation2 + $0x60] sm:$0xff] }
 0x20b   : > { %v1150_v43 = vadd.f32 %v2237_v23, %v1093_v52  ;;  %v1151_v46 = vadd.f32 %v2237_v23, %v1094_v11  ;;  %v1152_v4 = vadd.f32 %v2237_v23, %v1095_v38  ;;  %v1153_v50 = vadd.f32 %v2237_v23, %v1096_v37 }
 0x20c   : > { %v1196_v53 = vmax.f32 %v1146_v56, 0.0  ;;  %v1197_v12 = vmax.f32 %v1147_v29, 0.0  ;;  %v1198_v57 = vmax.f32 %v1148_v42, 0.0  ;;  %v1199_v58 = vmax.f32 %v1149_v60, 0.0 }
 0x20d   : > { %v1200_v61 = vmax.f32 %v1150_v43, 0.0  ;;  %v1201_v20 = vmax.f32 %v1151_v46, 0.0  ;;  %v1202_v62 = vmax.f32 %v1152_v4, 0.0  ;;  %v1203_v28 = vmax.f32 %v1153_v50, 0.0  ;;  %v1056_v50 = vld [vmem:[#allocation2 + $0x78] sm:$0xff] }
 0x20e   : > { %1246 = vst [vmem:[#allocation12 + $0xc0] sm:$0xff] %v1196_v53  ;;  %1247 = vst [vmem:[#allocation12 + $0xc8] sm:$0xff] %v1197_v12  ;;  %v1097_v55 = vmul.f32 %v2223_v2, %v1040_v41  ;;  %v1098_v5 = vmul.f32 %v2223_v2, %v1041_v15  ;;  %v1099_v9 = vmul.f32 %v2223_v2, %v1042_v0 }
 0x20f   : > { %1248 = vst [vmem:[#allocation12 + $0xd0] sm:$0xff] %v1198_v57  ;;  %1249 = vst [vmem:[#allocation12 + $0xd8] sm:$0xff] %v1199_v58  ;;  %v1100_v39 = vmul.f32 %v2223_v2, %v1043_v19  ;;  %v1101_v10 = vmul.f32 %v2223_v2, %v1044_v8  ;;  %v1102_v59 = vmul.f32 %v2223_v2, %v1045_v47  ;;  %v1057_v19 = vld [vmem:[#allocation2 + $0x150] sm:$0xff] }
 0x210   : > { %1250 = vst [vmem:[#allocation12 + $0xe0] sm:$0xff] %v1200_v61  ;;  %1251 = vst [vmem:[#allocation12 + $0xe8] sm:$0xff] %v1201_v20  ;;  %v1103_v54 = vmul.f32 %v2223_v2, %v1046_v16  ;;  %v1104_v13 = vmul.f32 %v2223_v2, %v1047_v51  ;;  %v1154_v34 = vadd.f32 %v2237_v23, %v1097_v55 }
 0x211   : > { %1252 = vst [vmem:[#allocation12 + $0xf0] sm:$0xff] %v1202_v62  ;;  %1253 = vst [vmem:[#allocation12 + $0xf8] sm:$0xff] %v1203_v28  ;;  %v1155_v6 = vadd.f32 %v2237_v23, %v1098_v5  ;;  %v1156_v18 = vadd.f32 %v2237_v23, %v1099_v9  ;;  %v1157_v49 = vadd.f32 %v2237_v23, %v1100_v39 }
 0x212   : > { %v1158_v32 = vadd.f32 %v2237_v23, %v1101_v10  ;;  %v1159_v25 = vadd.f32 %v2237_v23, %v1102_v59  ;;  %v1160_v45 = vadd.f32 %v2237_v23, %v1103_v54  ;;  %v1161_v3 = vadd.f32 %v2237_v23, %v1104_v13 }
 0x213   : > { %v1204_v1 = vmax.f32 %v1154_v34, 0.0  ;;  %v1205_v40 = vmax.f32 %v1155_v6, 0.0  ;;  %v1206_v30 = vmax.f32 %v1156_v18, 0.0  ;;  %v1207_v17 = vmax.f32 %v1157_v49, 0.0 }
 0x214   : > { %v1208_v7 = vmax.f32 %v1158_v32, 0.0  ;;  %v1209_v31 = vmax.f32 %v1159_v25, 0.0  ;;  %v1210_v48 = vmax.f32 %v1160_v45, 0.0  ;;  %v1211_v33 = vmax.f32 %v1161_v3, 0.0 }
 0x215   : > { %1254 = vst [vmem:[#allocation12 + $0x100] sm:$0xff] %v1204_v1  ;;  %1255 = vst [vmem:[#allocation12 + $0x108] sm:$0xff] %v1205_v40  ;;  %v1105_v27 = vmul.f32 %v2223_v2, %v1048_v22  ;;  %v1106_v35 = vmul.f32 %v2223_v2, %v1049_v63  ;;  %v1107_v52 = vmul.f32 %v2223_v2, %v1050_v21 }
 0x216   : > { %1256 = vst [vmem:[#allocation12 + $0x110] sm:$0xff] %v1206_v30  ;;  %1257 = vst [vmem:[#allocation12 + $0x118] sm:$0xff] %v1207_v17  ;;  %v1108_v11 = vmul.f32 %v2223_v2, %v1051_v36  ;;  %v1109_v38 = vmul.f32 %v2223_v2, %v1052_v24  ;;  %v1110_v37 = vmul.f32 %v2223_v2, %v1053_v26 }
 0x217   : > { %1258 = vst [vmem:[#allocation12 + $0x120] sm:$0xff] %v1208_v7  ;;  %1259 = vst [vmem:[#allocation12 + $0x128] sm:$0xff] %v1209_v31  ;;  %v1111_v56 = vmul.f32 %v2223_v2, %v1054_v14  ;;  %v1112_v29 = vmul.f32 %v2223_v2, %v1055_v44  ;;  %v1162_v42 = vadd.f32 %v2237_v23, %v1105_v27 }
 0x218   : > { %1260 = vst [vmem:[#allocation12 + $0x130] sm:$0xff] %v1210_v48  ;;  %1261 = vst [vmem:[#allocation12 + $0x138] sm:$0xff] %v1211_v33  ;;  %v1163_v60 = vadd.f32 %v2237_v23, %v1106_v35  ;;  %v1164_v41 = vadd.f32 %v2237_v23, %v1107_v52  ;;  %v1165_v15 = vadd.f32 %v2237_v23, %v1108_v11 }
 0x219   : > { %v1166_v0 = vadd.f32 %v2237_v23, %v1109_v38  ;;  %v1167_v43 = vadd.f32 %v2237_v23, %v1110_v37  ;;  %v1168_v46 = vadd.f32 %v2237_v23, %v1111_v56  ;;  %v1169_v4 = vadd.f32 %v2237_v23, %v1112_v29 }
 0x21a   : > { %v1212_v8 = vmax.f32 %v1162_v42, 0.0  ;;  %v1213_v47 = vmax.f32 %v1163_v60, 0.0  ;;  %v1214_v53 = vmax.f32 %v1164_v41, 0.0  ;;  %v1215_v12 = vmax.f32 %v1165_v15, 0.0 }
 0x21b   : > { %v1216_v57 = vmax.f32 %v1166_v0, 0.0  ;;  %v1217_v58 = vmax.f32 %v1167_v43, 0.0  ;;  %v1218_v16 = vmax.f32 %v1168_v46, 0.0  ;;  %v1219_v51 = vmax.f32 %v1169_v4, 0.0 }
 0x21c   : > { %1262 = vst [vmem:[#allocation12 + $0x140] sm:$0xff] %v1212_v8  ;;  %1263 = vst [vmem:[#allocation12 + $0x148] sm:$0xff] %v1213_v47  ;;  %v1113_v61 = vmul.f32 %v2223_v2, %v1056_v50  ;;  %v1114_v20 = vmul.f32 %v2223_v2, %v1057_v19 }
 0x21d   : > { %1264 = vst [vmem:[#allocation12 + $0x150] sm:$0xff] %v1214_v53  ;;  %1265 = vst [vmem:[#allocation12 + $0x158] sm:$0xff] %v1215_v12 }
 0x21e   : > { %1266 = vst [vmem:[#allocation12 + $0x160] sm:$0xff] %v1216_v57  ;;  %1267 = vst [vmem:[#allocation12 + $0x168] sm:$0xff] %v1217_v58  ;;  %v1170_v62 = vadd.f32 %v2237_v23, %v1113_v61  ;;  %v1171_v28 = vadd.f32 %v2237_v23, %v1114_v20 }
 0x21f   : > { %1268 = vst [vmem:[#allocation12 + $0x170] sm:$0xff] %v1218_v16  ;;  %1269 = vst [vmem:[#allocation12 + $0x178] sm:$0xff] %v1219_v51 }
 0x220   : > { %v1220_v55 = vmax.f32 %v1170_v62, 0.0  ;;  %v1221_v5 = vmax.f32 %v1171_v28, 0.0 }
 0x222   : > { %1270 = vst [vmem:[#allocation12 + $0x180] sm:$0xff] %v1220_v55  ;;  %1271 = vst [vmem:[#allocation12 + $0x188] sm:$0xff] %v1221_v5 }
 0x223 PF: > { %p2329_p5 = scmp.eq.s32.totalorder %s1382_s18, 1  ;;  %s1819_s21 = smov [#allocation12]  }
 0x224   : > { %s1287_s22 = sshll.u32 %s1819_s21, 4  ;;  %s1288_s22 = int_to_ptr.vmem [resolvable:$true] %s1287_s22 }
 0x225   : > { %s1752_s23 = scalar_lea.vmem %s1288_s22, 6400  ;;  %s1758_s24 = scalar_lea.vmem %s1288_s22, 12800 }
 0x226   : > { %p1753_p10 = scmp.ne.s32.totalorder %s1288_s22, %s1752_s23  ;;  %p1759_p12 = scmp.lt.s32.totalorder %s1288_s22, %s1288_s22 }
 0x227   : > { %p1760_p13 = scmp.lt.s32.totalorder %s1758_s24, %s1752_s23 }
 0x228   : > { %p1754_p11 = pnand %p1753_p10, %p2329_p5 }
 0x229   : > { %p1761_p0 = por %p1760_p13, %p1759_p12 }
 0x22a   : > { %p1755_p4 = pneg %p1754_p11 }
 0x22c   : > { %p1762_p1 = pnand %p1761_p0, %p1755_p4 }
 0x22e   : > { %1765 = shalt.err (!%p1762_p1)
}
 0x22f   : > { %s1820_s25 = smov 128   ;;  %s1821_s18 = smov 8  }
 0x230   : > { %1608 = dma.vmem_to_hbm [thread:$0]  (%p2329_p5), %s1288_s22, 6400, %s2357_s4, [#allocation9], %s1820_s25, %s1820_s25, %s1821_s18  }
 0x231 PF: > { %p1630_p2 = scmp.eq.s32.totalorder %s1383_s19, 1 }
 0x233   : > { %p1620_p7 = pnand %p1630_p2, %p1386_p6 }
 0x235   : > { %p1621_p8 = pneg %p1620_p7 }
 0x237   : > { %1797 = dma.done.wait (%p1621_p8), [#allocation9], 6400  }
 0x238   : > { %1799 = vsyncadd (%p1621_p8), [#allocation9], 4294960896  ;;  %s21_s17 = sadd.s32 1, %s1810_s17   ;;  %s2364_s15 = smov %s1806_s16 }
 0x239   : > { %p18_p9 = scmp.ge.s32.totalorder %s21_s17, 4   ;;  %s2365_s16 = smov %s2367_s20 }
 0x23b   :  { %20 = sbr.rel (!%p18_p9) target bundleno = 6 (0x6), region = 103 }
 0x240   :  { %1308 = vsyncpa [#allocation8], 1 }
 0x241   :  { %1310 = vsyncpa [#allocation8 + $0x1], 1 }
 0x242   :  { %1311 = vsyncpa [#allocation11], 1 }
 0x243   :  { %1312 = vsyncpa [#allocation9], 1 }
 0x244   :  { %1314 = vsyncpa [#allocation9 + $0x1], 1 }

</bundles_post_ra>
